<compile_context>
chip_gen: v7x
topology: tpu7x:2x2x1
jax: 0.10.0
libtpu: 0.0.40
codegen_flags: <defaults>
</compile_context>

<pallas_src>
import jax
import jax.numpy as jnp
from jax.experimental import pallas as pl
from jax.experimental.pallas import tpu as pltpu

_LANES = 128


def _round_up(a, b):
    return (a + b - 1) // b * b


def _bn_scale_shift(gamma, beta, mean, var, eps):
    scale = gamma * jax.lax.rsqrt(var + eps)
    return scale, beta - mean * scale


def _conv3x3_taps(w, k_pad, c_pad):
    """(Cout, Cin, 3, 3) -> (9, k_pad, c_pad) bf16, tap-major (t = dy*3 + dx)."""
    cout, cin = w.shape[0], w.shape[1]
    m = jnp.transpose(w, (2, 3, 1, 0)).reshape(9, cin, cout)
    m = jnp.pad(m, ((0, 0), (0, k_pad - cin), (0, c_pad - cout)))
    return m.astype(jnp.bfloat16)


def _conv1x1_mat(w, c_pad):
    """(Cout, Cin, 1, 1) -> (Cin, c_pad) bf16."""
    cout, cin = w.shape[0], w.shape[1]
    m = jnp.transpose(w.reshape(cout, cin), (1, 0))
    return jnp.pad(m, ((0, 0), (0, c_pad - cout))).astype(jnp.bfloat16)


# ------------------------------ fused kernel ------------------------------

def _make_block_kernel(stride, shall_downsample, Ho, Wo, Hph, Cin, Cpad):
    """Fused BasicBlockV2 kernel; one batch image per grid step."""
    s = stride
    R = Ho * Wo

    def kernel(xph_ref, w1_ref, w2_ref, s2_ref, b2_ref, res_ref, out_ref,
               x_scr, h_scr):
        # Upcast the bf16 activation band once into an f32 VMEM scratch: every
        # tap slice below then works on a plain (8,128)-tiled f32 layout.
        x_scr[...] = xph_ref[0].astype(jnp.float32)

        # ---- conv1: 3x3 / stride s / pad 1, fused im2col over the resident
        #      band: 9 shifted MXU dots into an f32 acc, BN2 fused epilogue.
        acc1 = jnp.zeros((R, Cpad), jnp.float32)
        for dy in range(3):
            for dx in range(3):
                p = (dy % s) * s + (dx % s)            # polyphase component
                r0 = p * Hph + dy // s                 # row offset in the band
                c0 = dx // s
                a = x_scr[r0:r0 + Ho, c0:c0 + Wo, :]   # (Ho, Wo, Cin) f32
                a = a.reshape(R, Cin).astype(jnp.bfloat16)
                acc1 = acc1 + jnp.dot(a, w1_ref[dy * 3 + dx],
                                      preferred_element_type=jnp.float32)
        h = acc1 * s2_ref[...] + b2_ref[...]           # BN2 (f32 epilogue)

        # Zero-padded h band for conv2's pad=1 (border rows/cols stay zero).
        h_scr[...] = jnp.zeros_like(h_scr)
        h_scr[1:Ho + 1, 1:Wo + 1, :] = h.reshape(Ho, Wo, Cpad)

        # ---- conv2: 3x3 / stride 1 / pad 1 over the VMEM-resident h band,
        #      residual fused into the same f32 accumulator.
        acc2 = jnp.zeros((R, Cpad), jnp.float32)
        for dy in range(3):
            for dx in range(3):
                a = h_scr[dy:dy + Ho, dx:dx + Wo, :]   # (Ho, Wo, Cpad) f32
                a = a.reshape(R, Cpad).astype(jnp.bfloat16)
                acc2 = acc2 + jnp.dot(a, w2_ref[dy * 3 + dx],
                                      preferred_element_type=jnp.float32)

        if shall_downsample:
            # Residual = 1x1 strided conv of bn1(x): one extra MXU dot on the
            # already-resident band (res_ref holds the (Cin, Cpad) weights),
            # no extra HBM round trip.
            p = (1 % s) * s + (1 % s)
            r0 = p * Hph + 1 // s
            c0 = 1 // s
            a = x_scr[r0:r0 + Ho, c0:c0 + Wo, :]
            a = a.reshape(R, Cin).astype(jnp.bfloat16)
            acc2 = acc2 + jnp.dot(a, res_ref[...],
                                  preferred_element_type=jnp.float32)
        else:
            # Identity residual: x itself (not bn1(x)), added in f32.
            acc2 = acc2 + res_ref[0].reshape(R, Cpad)

        out_ref[0] = acc2.reshape(Ho, Wo, Cpad).astype(out_ref.dtype)

    return kernel


# ------------------------------ block forward ------------------------------

def basic_block_v2_forward(x_nchw, params, stride, eps=1e-5):
    """BasicBlockV2 forward (inference / eval-mode BatchNorm). NCHW in/out."""
    N, Cin, H, W = x_nchw.shape
    Cout = params["conv1_w"].shape[0]
    shall_downsample = Cin != Cout
    if stride == -1:
        stride = 2 if shall_downsample else 1
    s = stride
    if not shall_downsample and s != 1:
        raise ValueError("identity residual requires stride == 1 "
                         "(same constraint as the reference module)")

    Ho = (H - 1) // s + 1                 # conv: floor((H + 2 - 3) / s) + 1
    Wo = (W - 1) // s + 1
    Cpad = _round_up(Cout, _LANES)
    ss = s * s
    halo = (2 + s - 1) // s               # extra rows/cols each phase needs
    Hph, Wph = Ho + halo, Wo + halo

    # --- ONE fused XLA pass over x: NHWC transpose, BN1 affine, zero-pad
    #     (after BN, as the conv requires), polyphase split (makes every
    #     in-kernel tap slice stride-1), bf16 cast. ---
    x_nhwc = jnp.transpose(x_nchw, (0, 2, 3, 1)).astype(jnp.float32)
    s1, b1 = _bn_scale_shift(params["bn1_gamma"], params["bn1_beta"],
                             params["bn1_mean"], params["bn1_var"], eps)
    bn1 = x_nhwc * s1 + b1
    band = jnp.pad(bn1, ((0, 0), (1, 1), (1, 1), (0, 0)))
    phases = []
    for py in range(s):
        for px in range(s):
            ph = band[:, py::s, px::s, :]
            ph = jnp.pad(ph, ((0, 0), (0, Hph - ph.shape[1]),
                              (0, Wph - ph.shape[2]), (0, 0)))
            phases.append(ph)
    # Phases stacked along H: phase p occupies rows [p*Hph, (p+1)*Hph).
    xph = jnp.concatenate(phases, axis=1).astype(jnp.bfloat16)  # (N, ss*Hph, Wph, Cin)

    # --- weights / BN2 params: bf16 / f32, VMEM-resident across the grid ---
    w1 = _conv3x3_taps(params["conv1_w"], Cin, Cpad)             # (9, Cin,  Cpad)
    w2 = _conv3x3_taps(params["conv2_w"], Cpad, Cpad)            # (9, Cpad, Cpad)
    s2, b2 = _bn_scale_shift(params["bn2_gamma"], params["bn2_beta"],
                             params["bn2_mean"], params["bn2_var"], eps)
    s2p = jnp.pad(s2, (0, Cpad - Cout)).reshape(1, Cpad).astype(jnp.float32)
    b2p = jnp.pad(b2, (0, Cpad - Cout)).reshape(1, Cpad).astype(jnp.float32)

    resident = dict(pipeline_mode=pl.Buffered(1))   # fetched once, one buffer
    in_specs = [
        pl.BlockSpec((1, ss * Hph, Wph, Cin), lambda n: (n, 0, 0, 0)),
        pl.BlockSpec((9, Cin, Cpad), lambda n: (0, 0, 0), **resident),
        pl.BlockSpec((9, Cpad, Cpad), lambda n: (0, 0, 0), **resident),
        pl.BlockSpec((1, Cpad), lambda n: (0, 0), **resident),
        pl.BlockSpec((1, Cpad), lambda n: (0, 0), **resident),
    ]
    operands = [xph, w1, w2, s2p, b2p]

    if shall_downsample:
        operands.append(_conv1x1_mat(params["ds_w"], Cpad))      # (Cin, Cpad)
        in_specs.append(pl.BlockSpec((Cin, Cpad), lambda n: (0, 0), **resident))
    else:
        # TODO(synk): the identity residual is channel-padded to Cpad here for
        # a lane-dense add; adding it in-kernel over the first Cout lanes
        # would save the padded HBM bytes.
        xres = jnp.pad(x_nhwc, ((0, 0), (0, 0), (0, 0), (0, Cpad - Cout)))
        operands.append(xres)
        in_specs.append(pl.BlockSpec((1, Ho, Wo, Cpad), lambda n: (n, 0, 0, 0)))

    kernel = _make_block_kernel(s, shall_downsample, Ho, Wo, Hph, Cin, Cpad)
    out = pl.pallas_call(
        kernel,
        out_shape=jax.ShapeDtypeStruct((N, Ho, Wo, Cpad), jnp.float32),
        grid=(N,),                           # one image per step (independent)
        in_specs=in_specs,
        out_specs=pl.BlockSpec((1, Ho, Wo, Cpad), lambda n: (n, 0, 0, 0)),
        scratch_shapes=[
            pltpu.VMEM((ss * Hph, Wph, Cin), jnp.float32),   # f32 bn1 band
            pltpu.VMEM((Ho + 2, Wo + 2, Cpad), jnp.float32), # zero-padded h
        ],
        compiler_params=pltpu.CompilerParams(
            dimension_semantics=("parallel",),
            vmem_limit_bytes=48 * 1024 * 1024),
    )(*operands)

    return jnp.transpose(out[..., :Cout], (0, 3, 1, 2))


# --------------------------- plain-JAX reference ---------------------------

def _ref_forward(x, params, stride, eps=1e-5, compute_dtype=jnp.bfloat16):
    """Reference with the same bf16 MXU operand points as the kernel."""
    def conv(v, w, s, pad):
        return jax.lax.conv_general_dilated(
            v.astype(compute_dtype), w.astype(compute_dtype), (s, s),
            [(pad, pad), (pad, pad)],
            dimension_numbers=("NCHW", "OIHW", "NCHW"),
            preferred_element_type=jnp.float32)

    Cin = x.shape[1]
    Cout = params["conv1_w"].shape[0]
    shall_downsample = Cin != Cout
    if stride == -1:
        stride = 2 if shall_downsample else 1

    s1, b1 = _bn_scale_shift(params["bn1_gamma"], params["bn1_beta"],
                             params["bn1_mean"], params["bn1_var"], eps)
    s2, b2 = _bn_scale_shift(params["bn2_gamma"], params["bn2_beta"],
                             params["bn2_mean"], params["bn2_var"], eps)

    bn1 = x * s1[None, :, None, None] + b1[None, :, None, None]
    residual = conv(bn1, params["ds_w"], stride, 0) if shall_downsample else x
    h = conv(bn1, params["conv1_w"], stride, 1)
    h = h * s2[None, :, None, None] + b2[None, :, None, None]
    h = conv(h, params["conv2_w"], 1, 1)
    return h + residual


if __name__ == "__main__":
    in_channels, out_channels, stride = 16, 32, -1  # in != out -> stride 2 + downsample
    batch, H, W = 2, 16, 16
    eps = 1e-5

    key = jax.random.PRNGKey(0)
    keys = jax.random.split(key, 12)

    params = {
        "bn1_gamma": jax.random.uniform(keys[0], (in_channels,), jnp.float32, 0.5, 1.5),
        "bn1_beta":  jax.random.normal(keys[1], (in_channels,), jnp.float32) * 0.1,
        "bn1_mean":  jax.random.normal(keys[2], (in_channels,), jnp.float32) * 0.1,
        "bn1_var":   jax.random.uniform(keys[3], (in_channels,), jnp.float32, 0.5, 1.5),
        "conv1_w":   jax.random.normal(keys[4], (out_channels, in_channels, 3, 3), jnp.float32) * 0.1,
        "bn2_gamma": jax.random.uniform(keys[5], (out_channels,), jnp.float32, 0.5, 1.5),
        "bn2_beta":  jax.random.normal(keys[6], (out_channels,), jnp.float32) * 0.1,
        "bn2_mean":  jax.random.normal(keys[7], (out_channels,), jnp.float32) * 0.1,
        "bn2_var":   jax.random.uniform(keys[8], (out_channels,), jnp.float32, 0.5, 1.5),
        "conv2_w":   jax.random.normal(keys[9], (out_channels, out_channels, 3, 3), jnp.float32) * 0.1,
        "ds_w":      jax.random.normal(keys[10], (out_channels, in_channels, 1, 1), jnp.float32) * 0.1,
    }
    x = jax.random.normal(keys[11], (batch, in_channels, H, W), jnp.float32)

    fwd = jax.jit(basic_block_v2_forward, static_argnames=("stride", "eps"))
    out = jax.block_until_ready(fwd(x, params, stride=stride, eps=eps))

    ref = _ref_forward(x, params, stride, eps)
    assert out.shape == ref.shape == (batch, out_channels, H // 2, W // 2)
    # bf16 MXU operands (per perf review) with f32 accumulation; the reference
    # casts its conv operands at the same points, so agreement is tight and the
    # tolerance only covers summation-order / cast-boundary differences.
    assert jnp.allclose(out, ref, atol=1e-2, rtol=1e-2), \
        float(jnp.max(jnp.abs(out - ref)))

    print("KERNEL_OK")
</pallas_src>

<mosaic_0001>
module attributes {stable_mosaic.version = 11 : i64} {
  func.func @kernel(%arg0: i32, %arg1: memref<1x36x9x16xbf16, #tpu.memory_space<vmem>>, %arg2: memref<9x16x128xbf16, #tpu.memory_space<vmem>>, %arg3: memref<9x128x128xbf16, #tpu.memory_space<vmem>>, %arg4: memref<1x128xf32, #tpu.memory_space<vmem>>, %arg5: memref<1x128xf32, #tpu.memory_space<vmem>>, %arg6: memref<16x128xbf16, #tpu.memory_space<vmem>>, %arg7: memref<1x8x8x128xf32, #tpu.memory_space<vmem>>, %arg8: memref<36x9x16xf32, #tpu.memory_space<vmem>>, %arg9: memref<10x10x128xf32, #tpu.memory_space<vmem>>) attributes {dimension_semantics = [#tpu.dimension_semantics<parallel>], iteration_bounds = array<i64: 2>, scalar_prefetch = 0 : i64, scratch_operands = 2 : i64, tpu.core_type = #tpu.core_type<tc>, window_params = [{transform_indices = @transform_0, window_bounds = array<i64: 1, 36, 9, 16>}, {pipeline_mode = #tpu.pipeline_mode<synchronous>, transform_indices = @transform_1, window_bounds = array<i64: 9, 16, 128>}, {pipeline_mode = #tpu.pipeline_mode<synchronous>, transform_indices = @transform_2, window_bounds = array<i64: 9, 128, 128>}, {pipeline_mode = #tpu.pipeline_mode<synchronous>, transform_indices = @transform_3, window_bounds = array<i64: 1, 128>}, {pipeline_mode = #tpu.pipeline_mode<synchronous>, transform_indices = @transform_4, window_bounds = array<i64: 1, 128>}, {pipeline_mode = #tpu.pipeline_mode<synchronous>, transform_indices = @transform_5, window_bounds = array<i64: 16, 128>}, {transform_indices = @transform_6, window_bounds = array<i64: 1, 8, 8, 128>}]} {
    %c0 = arith.constant 0 : index
    %c0_0 = arith.constant 0 : index
    %c0_1 = arith.constant 0 : index
    %c0_2 = arith.constant 0 : index
    %0 = vector.load %arg1[%c0, %c0_0, %c0_1, %c0_2] : memref<1x36x9x16xbf16, #tpu.memory_space<vmem>>, vector<1x36x9x16xbf16>
    %1 = vector.shape_cast %0 : vector<1x36x9x16xbf16> to vector<36x9x16xbf16>
    %2 = arith.extf %1 : vector<36x9x16xbf16> to vector<36x9x16xf32>
    %c0_3 = arith.constant 0 : index
    %c0_4 = arith.constant 0 : index
    %c0_5 = arith.constant 0 : index
    %3 = vector.load %arg8[%c0_3, %c0_4, %c0_5] : memref<36x9x16xf32, #tpu.memory_space<vmem>>, vector<36x9x16xf32>
    tpu.vector_store %arg8[%c0_3, %c0_4, %c0_5], %2 {strides = array<i32>} : memref<36x9x16xf32, #tpu.memory_space<vmem>>, vector<36x9x16xf32>,
    %cst = arith.constant 0.000000e+00 : f32
    %4 = vector.broadcast %cst : f32 to vector<64x128xf32>
    %c0_6 = arith.constant 0 : index
    %c0_7 = arith.constant 0 : index
    %c0_8 = arith.constant 0 : index
    %5 = vector.load %arg8[%c0_6, %c0_7, %c0_8] : memref<36x9x16xf32, #tpu.memory_space<vmem>>, vector<8x8x16xf32>
    %6 = vector.shape_cast %5 : vector<8x8x16xf32> to vector<64x16xf32>
    %7 = arith.truncf %6 : vector<64x16xf32> to vector<64x16xbf16>
    %c0_9 = arith.constant 0 : index
    %c0_10 = arith.constant 0 : index
    %c0_11 = arith.constant 0 : index
    %8 = vector.load %arg2[%c0_9, %c0_10, %c0_11] : memref<9x16x128xbf16, #tpu.memory_space<vmem>>, vector<1x16x128xbf16>
    %9 = vector.shape_cast %8 : vector<1x16x128xbf16> to vector<16x128xbf16>
    %cst_12 = arith.constant dense<0.000000e+00> : vector<64x128xf32>
    %10 = tpu.matmul %7, %9, %cst_12 {dimension_numbers = #tpu.dot_dimension_numbers<[1], [0], [0], [1], [0, 0, 1, 1], [], []>} : vector<64x16xbf16>, vector<16x128xbf16>, vector<64x128xf32> -> vector<64x128xf32>
    %11 = arith.addf %4, %10 : vector<64x128xf32>
    %c9 = arith.constant 9 : index
    %c0_13 = arith.constant 0 : index
    %c0_14 = arith.constant 0 : index
    %12 = vector.load %arg8[%c9, %c0_13, %c0_14] : memref<36x9x16xf32, #tpu.memory_space<vmem>>, vector<8x8x16xf32>
    %13 = vector.shape_cast %12 : vector<8x8x16xf32> to vector<64x16xf32>
    %14 = arith.truncf %13 : vector<64x16xf32> to vector<64x16xbf16>
    %c1 = arith.constant 1 : index
    %c0_15 = arith.constant 0 : index
    %c0_16 = arith.constant 0 : index
    %15 = vector.load %arg2[%c1, %c0_15, %c0_16] : memref<9x16x128xbf16, #tpu.memory_space<vmem>>, vector<1x16x128xbf16>
    %16 = vector.shape_cast %15 : vector<1x16x128xbf16> to vector<16x128xbf16>
    %cst_17 = arith.constant dense<0.000000e+00> : vector<64x128xf32>
    %17 = tpu.matmul %14, %16, %cst_17 {dimension_numbers = #tpu.dot_dimension_numbers<[1], [0], [0], [1], [0, 0, 1, 1], [], []>} : vector<64x16xbf16>, vector<16x128xbf16>, vector<64x128xf32> -> vector<64x128xf32>
    %18 = arith.addf %11, %17 : vector<64x128xf32>
    %c0_18 = arith.constant 0 : index
    %c1_19 = arith.constant 1 : index
    %c0_20 = arith.constant 0 : index
    %19 = vector.load %arg8[%c0_18, %c1_19, %c0_20] : memref<36x9x16xf32, #tpu.memory_space<vmem>>, vector<8x8x16xf32>
    %20 = vector.shape_cast %19 : vector<8x8x16xf32> to vector<64x16xf32>
    %21 = arith.truncf %20 : vector<64x16xf32> to vector<64x16xbf16>
    %c2 = arith.constant 2 : index
    %c0_21 = arith.constant 0 : index
    %c0_22 = arith.constant 0 : index
    %22 = vector.load %arg2[%c2, %c0_21, %c0_22] : memref<9x16x128xbf16, #tpu.memory_space<vmem>>, vector<1x16x128xbf16>
    %23 = vector.shape_cast %22 : vector<1x16x128xbf16> to vector<16x128xbf16>
    %cst_23 = arith.constant dense<0.000000e+00> : vector<64x128xf32>
    %24 = tpu.matmul %21, %23, %cst_23 {dimension_numbers = #tpu.dot_dimension_numbers<[1], [0], [0], [1], [0, 0, 1, 1], [], []>} : vector<64x16xbf16>, vector<16x128xbf16>, vector<64x128xf32> -> vector<64x128xf32>
    %25 = arith.addf %18, %24 : vector<64x128xf32>
    %c18 = arith.constant 18 : index
    %c0_24 = arith.constant 0 : index
    %c0_25 = arith.constant 0 : index
    %26 = vector.load %arg8[%c18, %c0_24, %c0_25] : memref<36x9x16xf32, #tpu.memory_space<vmem>>, vector<8x8x16xf32>
    %27 = vector.shape_cast %26 : vector<8x8x16xf32> to vector<64x16xf32>
    %28 = arith.truncf %27 : vector<64x16xf32> to vector<64x16xbf16>
    %c3 = arith.constant 3 : index
    %c0_26 = arith.constant 0 : index
    %c0_27 = arith.constant 0 : index
    %29 = vector.load %arg2[%c3, %c0_26, %c0_27] : memref<9x16x128xbf16, #tpu.memory_space<vmem>>, vector<1x16x128xbf16>
    %30 = vector.shape_cast %29 : vector<1x16x128xbf16> to vector<16x128xbf16>
    %cst_28 = arith.constant dense<0.000000e+00> : vector<64x128xf32>
    %31 = tpu.matmul %28, %30, %cst_28 {dimension_numbers = #tpu.dot_dimension_numbers<[1], [0], [0], [1], [0, 0, 1, 1], [], []>} : vector<64x16xbf16>, vector<16x128xbf16>, vector<64x128xf32> -> vector<64x128xf32>
    %32 = arith.addf %25, %31 : vector<64x128xf32>
    %c27 = arith.constant 27 : index
    %c0_29 = arith.constant 0 : index
    %c0_30 = arith.constant 0 : index
    %33 = vector.load %arg8[%c27, %c0_29, %c0_30] : memref<36x9x16xf32, #tpu.memory_space<vmem>>, vector<8x8x16xf32>
    %34 = vector.shape_cast %33 : vector<8x8x16xf32> to vector<64x16xf32>
    %35 = arith.truncf %34 : vector<64x16xf32> to vector<64x16xbf16>
    %c4 = arith.constant 4 : index
    %c0_31 = arith.constant 0 : index
    %c0_32 = arith.constant 0 : index
    %36 = vector.load %arg2[%c4, %c0_31, %c0_32] : memref<9x16x128xbf16, #tpu.memory_space<vmem>>, vector<1x16x128xbf16>
    %37 = vector.shape_cast %36 : vector<1x16x128xbf16> to vector<16x128xbf16>
    %cst_33 = arith.constant dense<0.000000e+00> : vector<64x128xf32>
    %38 = tpu.matmul %35, %37, %cst_33 {dimension_numbers = #tpu.dot_dimension_numbers<[1], [0], [0], [1], [0, 0, 1, 1], [], []>} : vector<64x16xbf16>, vector<16x128xbf16>, vector<64x128xf32> -> vector<64x128xf32>
    %39 = arith.addf %32, %38 : vector<64x128xf32>
    %c18_34 = arith.constant 18 : index
    %c1_35 = arith.constant 1 : index
    %c0_36 = arith.constant 0 : index
    %40 = vector.load %arg8[%c18_34, %c1_35, %c0_36] : memref<36x9x16xf32, #tpu.memory_space<vmem>>, vector<8x8x16xf32>
    %41 = vector.shape_cast %40 : vector<8x8x16xf32> to vector<64x16xf32>
    %42 = arith.truncf %41 : vector<64x16xf32> to vector<64x16xbf16>
    %c5 = arith.constant 5 : index
    %c0_37 = arith.constant 0 : index
    %c0_38 = arith.constant 0 : index
    %43 = vector.load %arg2[%c5, %c0_37, %c0_38] : memref<9x16x128xbf16, #tpu.memory_space<vmem>>, vector<1x16x128xbf16>
    %44 = vector.shape_cast %43 : vector<1x16x128xbf16> to vector<16x128xbf16>
    %cst_39 = arith.constant dense<0.000000e+00> : vector<64x128xf32>
    %45 = tpu.matmul %42, %44, %cst_39 {dimension_numbers = #tpu.dot_dimension_numbers<[1], [0], [0], [1], [0, 0, 1, 1], [], []>} : vector<64x16xbf16>, vector<16x128xbf16>, vector<64x128xf32> -> vector<64x128xf32>
    %46 = arith.addf %39, %45 : vector<64x128xf32>
    %c1_40 = arith.constant 1 : index
    %c0_41 = arith.constant 0 : index
    %c0_42 = arith.constant 0 : index
    %47 = vector.load %arg8[%c1_40, %c0_41, %c0_42] : memref<36x9x16xf32, #tpu.memory_space<vmem>>, vector<8x8x16xf32>
    %48 = vector.shape_cast %47 : vector<8x8x16xf32> to vector<64x16xf32>
    %49 = arith.truncf %48 : vector<64x16xf32> to vector<64x16xbf16>
    %c6 = arith.constant 6 : index
    %c0_43 = arith.constant 0 : index
    %c0_44 = arith.constant 0 : index
    %50 = vector.load %arg2[%c6, %c0_43, %c0_44] : memref<9x16x128xbf16, #tpu.memory_space<vmem>>, vector<1x16x128xbf16>
    %51 = vector.shape_cast %50 : vector<1x16x128xbf16> to vector<16x128xbf16>
    %cst_45 = arith.constant dense<0.000000e+00> : vector<64x128xf32>
    %52 = tpu.matmul %49, %51, %cst_45 {dimension_numbers = #tpu.dot_dimension_numbers<[1], [0], [0], [1], [0, 0, 1, 1], [], []>} : vector<64x16xbf16>, vector<16x128xbf16>, vector<64x128xf32> -> vector<64x128xf32>
    %53 = arith.addf %46, %52 : vector<64x128xf32>
    %c10 = arith.constant 10 : index
    %c0_46 = arith.constant 0 : index
    %c0_47 = arith.constant 0 : index
    %54 = vector.load %arg8[%c10, %c0_46, %c0_47] : memref<36x9x16xf32, #tpu.memory_space<vmem>>, vector<8x8x16xf32>
    %55 = vector.shape_cast %54 : vector<8x8x16xf32> to vector<64x16xf32>
    %56 = arith.truncf %55 : vector<64x16xf32> to vector<64x16xbf16>
    %c7 = arith.constant 7 : index
    %c0_48 = arith.constant 0 : index
    %c0_49 = arith.constant 0 : index
    %57 = vector.load %arg2[%c7, %c0_48, %c0_49] : memref<9x16x128xbf16, #tpu.memory_space<vmem>>, vector<1x16x128xbf16>
    %58 = vector.shape_cast %57 : vector<1x16x128xbf16> to vector<16x128xbf16>
    %cst_50 = arith.constant dense<0.000000e+00> : vector<64x128xf32>
    %59 = tpu.matmul %56, %58, %cst_50 {dimension_numbers = #tpu.dot_dimension_numbers<[1], [0], [0], [1], [0, 0, 1, 1], [], []>} : vector<64x16xbf16>, vector<16x128xbf16>, vector<64x128xf32> -> vector<64x128xf32>
    %60 = arith.addf %53, %59 : vector<64x128xf32>
    %c1_51 = arith.constant 1 : index
    %c1_52 = arith.constant 1 : index
    %c0_53 = arith.constant 0 : index
    %61 = vector.load %arg8[%c1_51, %c1_52, %c0_53] : memref<36x9x16xf32, #tpu.memory_space<vmem>>, vector<8x8x16xf32>
    %62 = vector.shape_cast %61 : vector<8x8x16xf32> to vector<64x16xf32>
    %63 = arith.truncf %62 : vector<64x16xf32> to vector<64x16xbf16>
    %c8 = arith.constant 8 : index
    %c0_54 = arith.constant 0 : index
    %c0_55 = arith.constant 0 : index
    %64 = vector.load %arg2[%c8, %c0_54, %c0_55] : memref<9x16x128xbf16, #tpu.memory_space<vmem>>, vector<1x16x128xbf16>
    %65 = vector.shape_cast %64 : vector<1x16x128xbf16> to vector<16x128xbf16>
    %cst_56 = arith.constant dense<0.000000e+00> : vector<64x128xf32>
    %66 = tpu.matmul %63, %65, %cst_56 {dimension_numbers = #tpu.dot_dimension_numbers<[1], [0], [0], [1], [0, 0, 1, 1], [], []>} : vector<64x16xbf16>, vector<16x128xbf16>, vector<64x128xf32> -> vector<64x128xf32>
    %67 = arith.addf %60, %66 : vector<64x128xf32>
    %c0_57 = arith.constant 0 : index
    %c0_58 = arith.constant 0 : index
    %68 = vector.load %arg4[%c0_57, %c0_58] : memref<1x128xf32, #tpu.memory_space<vmem>>, vector<1x128xf32>
    %69 = vector.broadcast %68 : vector<1x128xf32> to vector<64x128xf32>
    %70 = arith.mulf %67, %69 : vector<64x128xf32>
    %c0_59 = arith.constant 0 : index
    %c0_60 = arith.constant 0 : index
    %71 = vector.load %arg5[%c0_59, %c0_60] : memref<1x128xf32, #tpu.memory_space<vmem>>, vector<1x128xf32>
    %72 = vector.broadcast %71 : vector<1x128xf32> to vector<64x128xf32>
    %73 = arith.addf %70, %72 : vector<64x128xf32>
    %cst_61 = arith.constant 0.000000e+00 : f32
    %74 = vector.broadcast %cst_61 : f32 to vector<10x10x128xf32>
    %c0_62 = arith.constant 0 : index
    %c0_63 = arith.constant 0 : index
    %c0_64 = arith.constant 0 : index
    %75 = vector.load %arg9[%c0_62, %c0_63, %c0_64] : memref<10x10x128xf32, #tpu.memory_space<vmem>>, vector<10x10x128xf32>
    tpu.vector_store %arg9[%c0_62, %c0_63, %c0_64], %74 {strides = array<i32>} : memref<10x10x128xf32, #tpu.memory_space<vmem>>, vector<10x10x128xf32>,
    %76 = vector.shape_cast %73 : vector<64x128xf32> to vector<8x8x128xf32>
    %c1_65 = arith.constant 1 : index
    %c1_66 = arith.constant 1 : index
    %c0_67 = arith.constant 0 : index
    %77 = vector.load %arg9[%c1_65, %c1_66, %c0_67] : memref<10x10x128xf32, #tpu.memory_space<vmem>>, vector<8x8x128xf32>
    tpu.vector_store %arg9[%c1_65, %c1_66, %c0_67], %76 {strides = array<i32>} : memref<10x10x128xf32, #tpu.memory_space<vmem>>, vector<8x8x128xf32>,
    %cst_68 = arith.constant 0.000000e+00 : f32
    %78 = vector.broadcast %cst_68 : f32 to vector<64x128xf32>
    %c0_69 = arith.constant 0 : index
    %c0_70 = arith.constant 0 : index
    %c0_71 = arith.constant 0 : index
    %79 = vector.load %arg9[%c0_69, %c0_70, %c0_71] : memref<10x10x128xf32, #tpu.memory_space<vmem>>, vector<8x8x128xf32>
    %80 = vector.shape_cast %79 : vector<8x8x128xf32> to vector<64x128xf32>
    %81 = arith.truncf %80 : vector<64x128xf32> to vector<64x128xbf16>
    %c0_72 = arith.constant 0 : index
    %c0_73 = arith.constant 0 : index
    %c0_74 = arith.constant 0 : index
    %82 = vector.load %arg3[%c0_72, %c0_73, %c0_74] : memref<9x128x128xbf16, #tpu.memory_space<vmem>>, vector<1x128x128xbf16>
    %83 = vector.shape_cast %82 : vector<1x128x128xbf16> to vector<128x128xbf16>
    %cst_75 = arith.constant dense<0.000000e+00> : vector<64x128xf32>
    %84 = tpu.matmul %81, %83, %cst_75 {dimension_numbers = #tpu.dot_dimension_numbers<[1], [0], [0], [1], [0, 0, 1, 1], [], []>} : vector<64x128xbf16>, vector<128x128xbf16>, vector<64x128xf32> -> vector<64x128xf32>
    %85 = arith.addf %78, %84 : vector<64x128xf32>
    %c0_76 = arith.constant 0 : index
    %c1_77 = arith.constant 1 : index
    %c0_78 = arith.constant 0 : index
    %86 = vector.load %arg9[%c0_76, %c1_77, %c0_78] : memref<10x10x128xf32, #tpu.memory_space<vmem>>, vector<8x8x128xf32>
    %87 = vector.shape_cast %86 : vector<8x8x128xf32> to vector<64x128xf32>
    %88 = arith.truncf %87 : vector<64x128xf32> to vector<64x128xbf16>
    %c1_79 = arith.constant 1 : index
    %c0_80 = arith.constant 0 : index
    %c0_81 = arith.constant 0 : index
    %89 = vector.load %arg3[%c1_79, %c0_80, %c0_81] : memref<9x128x128xbf16, #tpu.memory_space<vmem>>, vector<1x128x128xbf16>
    %90 = vector.shape_cast %89 : vector<1x128x128xbf16> to vector<128x128xbf16>
    %cst_82 = arith.constant dense<0.000000e+00> : vector<64x128xf32>
    %91 = tpu.matmul %88, %90, %cst_82 {dimension_numbers = #tpu.dot_dimension_numbers<[1], [0], [0], [1], [0, 0, 1, 1], [], []>} : vector<64x128xbf16>, vector<128x128xbf16>, vector<64x128xf32> -> vector<64x128xf32>
    %92 = arith.addf %85, %91 : vector<64x128xf32>
    %c0_83 = arith.constant 0 : index
    %c2_84 = arith.constant 2 : index
    %c0_85 = arith.constant 0 : index
    %93 = vector.load %arg9[%c0_83, %c2_84, %c0_85] : memref<10x10x128xf32, #tpu.memory_space<vmem>>, vector<8x8x128xf32>
    %94 = vector.shape_cast %93 : vector<8x8x128xf32> to vector<64x128xf32>
    %95 = arith.truncf %94 : vector<64x128xf32> to vector<64x128xbf16>
    %c2_86 = arith.constant 2 : index
    %c0_87 = arith.constant 0 : index
    %c0_88 = arith.constant 0 : index
    %96 = vector.load %arg3[%c2_86, %c0_87, %c0_88] : memref<9x128x128xbf16, #tpu.memory_space<vmem>>, vector<1x128x128xbf16>
    %97 = vector.shape_cast %96 : vector<1x128x128xbf16> to vector<128x128xbf16>
    %cst_89 = arith.constant dense<0.000000e+00> : vector<64x128xf32>
    %98 = tpu.matmul %95, %97, %cst_89 {dimension_numbers = #tpu.dot_dimension_numbers<[1], [0], [0], [1], [0, 0, 1, 1], [], []>} : vector<64x128xbf16>, vector<128x128xbf16>, vector<64x128xf32> -> vector<64x128xf32>
    %99 = arith.addf %92, %98 : vector<64x128xf32>
    %c1_90 = arith.constant 1 : index
    %c0_91 = arith.constant 0 : index
    %c0_92 = arith.constant 0 : index
    %100 = vector.load %arg9[%c1_90, %c0_91, %c0_92] : memref<10x10x128xf32, #tpu.memory_space<vmem>>, vector<8x8x128xf32>
    %101 = vector.shape_cast %100 : vector<8x8x128xf32> to vector<64x128xf32>
    %102 = arith.truncf %101 : vector<64x128xf32> to vector<64x128xbf16>
    %c3_93 = arith.constant 3 : index
    %c0_94 = arith.constant 0 : index
    %c0_95 = arith.constant 0 : index
    %103 = vector.load %arg3[%c3_93, %c0_94, %c0_95] : memref<9x128x128xbf16, #tpu.memory_space<vmem>>, vector<1x128x128xbf16>
    %104 = vector.shape_cast %103 : vector<1x128x128xbf16> to vector<128x128xbf16>
    %cst_96 = arith.constant dense<0.000000e+00> : vector<64x128xf32>
    %105 = tpu.matmul %102, %104, %cst_96 {dimension_numbers = #tpu.dot_dimension_numbers<[1], [0], [0], [1], [0, 0, 1, 1], [], []>} : vector<64x128xbf16>, vector<128x128xbf16>, vector<64x128xf32> -> vector<64x128xf32>
    %106 = arith.addf %99, %105 : vector<64x128xf32>
    %c1_97 = arith.constant 1 : index
    %c1_98 = arith.constant 1 : index
    %c0_99 = arith.constant 0 : index
    %107 = vector.load %arg9[%c1_97, %c1_98, %c0_99] : memref<10x10x128xf32, #tpu.memory_space<vmem>>, vector<8x8x128xf32>
    %108 = vector.shape_cast %107 : vector<8x8x128xf32> to vector<64x128xf32>
    %109 = arith.truncf %108 : vector<64x128xf32> to vector<64x128xbf16>
    %c4_100 = arith.constant 4 : index
    %c0_101 = arith.constant 0 : index
    %c0_102 = arith.constant 0 : index
    %110 = vector.load %arg3[%c4_100, %c0_101, %c0_102] : memref<9x128x128xbf16, #tpu.memory_space<vmem>>, vector<1x128x128xbf16>
    %111 = vector.shape_cast %110 : vector<1x128x128xbf16> to vector<128x128xbf16>
    %cst_103 = arith.constant dense<0.000000e+00> : vector<64x128xf32>
    %112 = tpu.matmul %109, %111, %cst_103 {dimension_numbers = #tpu.dot_dimension_numbers<[1], [0], [0], [1], [0, 0, 1, 1], [], []>} : vector<64x128xbf16>, vector<128x128xbf16>, vector<64x128xf32> -> vector<64x128xf32>
    %113 = arith.addf %106, %112 : vector<64x128xf32>
    %c1_104 = arith.constant 1 : index
    %c2_105 = arith.constant 2 : index
    %c0_106 = arith.constant 0 : index
    %114 = vector.load %arg9[%c1_104, %c2_105, %c0_106] : memref<10x10x128xf32, #tpu.memory_space<vmem>>, vector<8x8x128xf32>
    %115 = vector.shape_cast %114 : vector<8x8x128xf32> to vector<64x128xf32>
    %116 = arith.truncf %115 : vector<64x128xf32> to vector<64x128xbf16>
    %c5_107 = arith.constant 5 : index
    %c0_108 = arith.constant 0 : index
    %c0_109 = arith.constant 0 : index
    %117 = vector.load %arg3[%c5_107, %c0_108, %c0_109] : memref<9x128x128xbf16, #tpu.memory_space<vmem>>, vector<1x128x128xbf16>
    %118 = vector.shape_cast %117 : vector<1x128x128xbf16> to vector<128x128xbf16>
    %cst_110 = arith.constant dense<0.000000e+00> : vector<64x128xf32>
    %119 = tpu.matmul %116, %118, %cst_110 {dimension_numbers = #tpu.dot_dimension_numbers<[1], [0], [0], [1], [0, 0, 1, 1], [], []>} : vector<64x128xbf16>, vector<128x128xbf16>, vector<64x128xf32> -> vector<64x128xf32>
    %120 = arith.addf %113, %119 : vector<64x128xf32>
    %c2_111 = arith.constant 2 : index
    %c0_112 = arith.constant 0 : index
    %c0_113 = arith.constant 0 : index
    %121 = vector.load %arg9[%c2_111, %c0_112, %c0_113] : memref<10x10x128xf32, #tpu.memory_space<vmem>>, vector<8x8x128xf32>
    %122 = vector.shape_cast %121 : vector<8x8x128xf32> to vector<64x128xf32>
    %123 = arith.truncf %122 : vector<64x128xf32> to vector<64x128xbf16>
    %c6_114 = arith.constant 6 : index
    %c0_115 = arith.constant 0 : index
    %c0_116 = arith.constant 0 : index
    %124 = vector.load %arg3[%c6_114, %c0_115, %c0_116] : memref<9x128x128xbf16, #tpu.memory_space<vmem>>, vector<1x128x128xbf16>
    %125 = vector.shape_cast %124 : vector<1x128x128xbf16> to vector<128x128xbf16>
    %cst_117 = arith.constant dense<0.000000e+00> : vector<64x128xf32>
    %126 = tpu.matmul %123, %125, %cst_117 {dimension_numbers = #tpu.dot_dimension_numbers<[1], [0], [0], [1], [0, 0, 1, 1], [], []>} : vector<64x128xbf16>, vector<128x128xbf16>, vector<64x128xf32> -> vector<64x128xf32>
    %127 = arith.addf %120, %126 : vector<64x128xf32>
    %c2_118 = arith.constant 2 : index
    %c1_119 = arith.constant 1 : index
    %c0_120 = arith.constant 0 : index
    %128 = vector.load %arg9[%c2_118, %c1_119, %c0_120] : memref<10x10x128xf32, #tpu.memory_space<vmem>>, vector<8x8x128xf32>
    %129 = vector.shape_cast %128 : vector<8x8x128xf32> to vector<64x128xf32>
    %130 = arith.truncf %129 : vector<64x128xf32> to vector<64x128xbf16>
    %c7_121 = arith.constant 7 : index
    %c0_122 = arith.constant 0 : index
    %c0_123 = arith.constant 0 : index
    %131 = vector.load %arg3[%c7_121, %c0_122, %c0_123] : memref<9x128x128xbf16, #tpu.memory_space<vmem>>, vector<1x128x128xbf16>
    %132 = vector.shape_cast %131 : vector<1x128x128xbf16> to vector<128x128xbf16>
    %cst_124 = arith.constant dense<0.000000e+00> : vector<64x128xf32>
    %133 = tpu.matmul %130, %132, %cst_124 {dimension_numbers = #tpu.dot_dimension_numbers<[1], [0], [0], [1], [0, 0, 1, 1], [], []>} : vector<64x128xbf16>, vector<128x128xbf16>, vector<64x128xf32> -> vector<64x128xf32>
    %134 = arith.addf %127, %133 : vector<64x128xf32>
    %c2_125 = arith.constant 2 : index
    %c2_126 = arith.constant 2 : index
    %c0_127 = arith.constant 0 : index
    %135 = vector.load %arg9[%c2_125, %c2_126, %c0_127] : memref<10x10x128xf32, #tpu.memory_space<vmem>>, vector<8x8x128xf32>
    %136 = vector.shape_cast %135 : vector<8x8x128xf32> to vector<64x128xf32>
    %137 = arith.truncf %136 : vector<64x128xf32> to vector<64x128xbf16>
    %c8_128 = arith.constant 8 : index
    %c0_129 = arith.constant 0 : index
    %c0_130 = arith.constant 0 : index
    %138 = vector.load %arg3[%c8_128, %c0_129, %c0_130] : memref<9x128x128xbf16, #tpu.memory_space<vmem>>, vector<1x128x128xbf16>
    %139 = vector.shape_cast %138 : vector<1x128x128xbf16> to vector<128x128xbf16>
    %cst_131 = arith.constant dense<0.000000e+00> : vector<64x128xf32>
    %140 = tpu.matmul %137, %139, %cst_131 {dimension_numbers = #tpu.dot_dimension_numbers<[1], [0], [0], [1], [0, 0, 1, 1], [], []>} : vector<64x128xbf16>, vector<128x128xbf16>, vector<64x128xf32> -> vector<64x128xf32>
    %141 = arith.addf %134, %140 : vector<64x128xf32>
    %c27_132 = arith.constant 27 : index
    %c0_133 = arith.constant 0 : index
    %c0_134 = arith.constant 0 : index
    %142 = vector.load %arg8[%c27_132, %c0_133, %c0_134] : memref<36x9x16xf32, #tpu.memory_space<vmem>>, vector<8x8x16xf32>
    %143 = vector.shape_cast %142 : vector<8x8x16xf32> to vector<64x16xf32>
    %144 = arith.truncf %143 : vector<64x16xf32> to vector<64x16xbf16>
    %c0_135 = arith.constant 0 : index
    %c0_136 = arith.constant 0 : index
    %145 = vector.load %arg6[%c0_135, %c0_136] : memref<16x128xbf16, #tpu.memory_space<vmem>>, vector<16x128xbf16>
    %cst_137 = arith.constant dense<0.000000e+00> : vector<64x128xf32>
    %146 = tpu.matmul %144, %145, %cst_137 {dimension_numbers = #tpu.dot_dimension_numbers<[1], [0], [0], [1], [0, 0, 1, 1], [], []>} : vector<64x16xbf16>, vector<16x128xbf16>, vector<64x128xf32> -> vector<64x128xf32>
    %147 = arith.addf %141, %146 : vector<64x128xf32>
    %148 = vector.shape_cast %147 : vector<64x128xf32> to vector<8x8x128xf32>
    %c0_138 = arith.constant 0 : index
    %c0_139 = arith.constant 0 : index
    %c0_140 = arith.constant 0 : index
    %c0_141 = arith.constant 0 : index
    %149 = vector.load %arg7[%c0_138, %c0_139, %c0_140, %c0_141] : memref<1x8x8x128xf32, #tpu.memory_space<vmem>>, vector<1x8x8x128xf32>
    %150 = vector.shape_cast %149 : vector<1x8x8x128xf32> to vector<8x8x128xf32>
    %151 = vector.shape_cast %148 : vector<8x8x128xf32> to vector<1x8x8x128xf32>
    tpu.vector_store %arg7[%c0_138, %c0_139, %c0_140, %c0_141], %151 {strides = array<i32>} : memref<1x8x8x128xf32, #tpu.memory_space<vmem>>, vector<1x8x8x128xf32>,
    return
  }
  func.func @transform_0(%arg0: i32) -> (i32, i32, i32, i32) {
    %c0_i32 = arith.constant 0 : i32
    %c0_i32_0 = arith.constant 0 : i32
    %c0_i32_1 = arith.constant 0 : i32
    %c0_i32_2 = arith.constant 0 : i32
    return %arg0, %c0_i32, %c0_i32_0, %c0_i32_1 : i32, i32, i32, i32
  }
  func.func @transform_1(%arg0: i32) -> (i32, i32, i32) {
    %c0_i32 = arith.constant 0 : i32
    %c0_i32_0 = arith.constant 0 : i32
    %c0_i32_1 = arith.constant 0 : i32
    %c0_i32_2 = arith.constant 0 : i32
    return %c0_i32, %c0_i32_0, %c0_i32_1 : i32, i32, i32
  }
  func.func @transform_2(%arg0: i32) -> (i32, i32, i32) {
    %c0_i32 = arith.constant 0 : i32
    %c0_i32_0 = arith.constant 0 : i32
    %c0_i32_1 = arith.constant 0 : i32
    %c0_i32_2 = arith.constant 0 : i32
    return %c0_i32, %c0_i32_0, %c0_i32_1 : i32, i32, i32
  }
  func.func @transform_3(%arg0: i32) -> (i32, i32) {
    %c0_i32 = arith.constant 0 : i32
    %c0_i32_0 = arith.constant 0 : i32
    %c0_i32_1 = arith.constant 0 : i32
    return %c0_i32, %c0_i32_0 : i32, i32
  }
  func.func @transform_4(%arg0: i32) -> (i32, i32) {
    %c0_i32 = arith.constant 0 : i32
    %c0_i32_0 = arith.constant 0 : i32
    %c0_i32_1 = arith.constant 0 : i32
    return %c0_i32, %c0_i32_0 : i32, i32
  }
  func.func @transform_5(%arg0: i32) -> (i32, i32) {
    %c0_i32 = arith.constant 0 : i32
    %c0_i32_0 = arith.constant 0 : i32
    %c0_i32_1 = arith.constant 0 : i32
    return %c0_i32, %c0_i32_0 : i32, i32
  }
  func.func @transform_6(%arg0: i32) -> (i32, i32, i32, i32) {
    %c0_i32 = arith.constant 0 : i32
    %c0_i32_0 = arith.constant 0 : i32
    %c0_i32_1 = arith.constant 0 : i32
    %c0_i32_2 = arith.constant 0 : i32
    return %arg0, %c0_i32, %c0_i32_0, %c0_i32_1 : i32, i32, i32, i32
  }
}

</mosaic_0001>

<bundles_post_ra>
// kernel: basic_block_v2_forward.1
= control target key start
LH: loop header
LB: loop body
LE: loop exit
PB: predicated region body
PF: predicated region fallthrough
CT: control target
= control target key end

     0   :  { %s3999_s21 = smov 0   ;;  %s4680_s0 = inlined_call_operand.vmem [shape: bf16[2,36,9,16], index: 0, kind: input, shape index: {}]   ;;  %s4681_s1 = inlined_call_operand.vmem [shape: bf16[9,16,128], index: 1, kind: input, shape index: {}]   ;;  %s4682_s2 = inlined_call_operand.vmem [shape: bf16[9,128,128], index: 2, kind: input, shape index: {}]   ;;  %s4683_s3 = inlined_call_operand.vmem [shape: f32[1,128], index: 3, kind: input, shape index: {}]   ;;  %s4684_s4 = inlined_call_operand.vmem [shape: f32[1,128], index: 4, kind: input, shape index: {}]   ;;  %s4685_s5 = inlined_call_operand.vmem [shape: bf16[16,128], index: 5, kind: input, shape index: {}]   ;;  %s4686_s6 = inlined_call_operand.vmem [shape: f32[2,8,8,128], index: 6, kind: output, shape index: {}]  }
   0x1 LB: > { %s2974_s22 = sadd.s32 4294967295, %s3961_s21   ;;  %p2978_p0 = scmp.ge.s32.totalorder %s3961_s21, 1  ;;  %s3961_s21 = sphi %s3999_s21, %s16_s21  }
   0x2   : > { %p212_p1 = scmp.lt.s32.totalorder %s3961_s21, 3 }
   0x4   : > { %p213_p2 = pnand %p2978_p0, %p212_p1 }
   0x5   : > { %v3873_v0 = vld [vmem:[%s4681_s1 + $0x8] sm:$0xff] (!%p213_p2)   ;;  %p242_p3 = scmp.lt.s32.totalorder (!%p213_p2), %s2974_s22, 1  ;;  %v4013_v1 = vld [vmem:[%s4681_s1] sm:$0xff] (!%p213_p2)   ;;  %vm397_vm0 = vcmask (!%p213_p2), 130048   ;;  %vm399_vm1 = vcmask (!%p213_p2), 122880   ;;  %v4071_v41 = vld [vmem:[%s4681_s1 + $0x10] sm:$0xff] (!%p213_p2)  }
   0x6   : > { %216 = sbr.rel (%p213_p2) target bundleno = 808 (0x328), region = 44  ;;  %3411 = vmatprep.subr.bf16.mxu0 (!%p213_p2), %v3873_v0 }
   0x7   : > { %3412 = vmatpush3.bf16.msra.mxu0 (!%p213_p2), %v3873_v0 }
   0x8   : > { %3421 = vmatprep.subr.bf16.mxu0 (!%p213_p2), %v4013_v1 }
   0xd   : > { %s4688_s22 = smov (!%p242_p3, %s2974_s22), 1 }
   0xe   : > { %s3863_s27 = smul.u32 288, %s4688_s22  ;;  %s3252_s17 = sshll.u32 %s4688_s22, 6 }
   0xf   : > { %s251_s20 = scalar_lea.vmem %s4686_s6, %s3252_s17 }
  0x10   : > { %s4022_s30 = scalar_lea.vmem %s4680_s0, %s3863_s27 }
  0x11   : > { %v271_v2 = vld [vmem:[%s4022_s30 + $0x48] ss:$8 sps:$4 sm:$0xff]   ;;  %v275_v3 = vld [vmem:[%s4022_s30 + $0x58] ss:$8 sps:$4 sm:$0xff]   ;;  %v254_v20 = vld [vmem:[%s4022_s30 + $0x4] sm:$0x1] }
  0x12   : > { %v343_v4 = vunpack.c.l.bf16 %v271_v2  ;;  %v345_v5 = vunpack.c.h.bf16 %v271_v2  ;;  %v279_v6 = vld [vmem:[%s4022_s30 + $0x68] ss:$8 sps:$4 sm:$0xff]   ;;  %v283_v7 = vld [vmem:[%s4022_s30 + $0x78] ss:$8 sps:$4 sm:$0xff]   ;;  %v347_v9 = vunpack.c.l.bf16 %v275_v3  ;;  %v349_v10 = vunpack.c.h.bf16 %v275_v3  ;;  %v256_v21 = vld [vmem:[%s4022_s30 + $0xc] sm:$0x1] }
  0x13   : > { %v253_v8 = vld [vmem:[%s4022_s30] ss:$8 sps:$4 sm:$0xff]   ;;  %v351_v11 = vunpack.c.l.bf16 %v279_v6  ;;  %v353_v12 = vunpack.c.h.bf16 %v279_v6  ;;  %v257_v13 = vld [vmem:[%s4022_s30 + $0x10] ss:$8 sps:$4 sm:$0xff]   ;;  %v355_v16 = vunpack.c.l.bf16 %v283_v7  ;;  %v357_v17 = vunpack.c.h.bf16 %v283_v7  ;;  %v258_v32 = vld [vmem:[%s4022_s30 + $0x14] sm:$0x1] }
  0x14   : > { %v261_v14 = vld [vmem:[%s4022_s30 + $0x20] ss:$8 sps:$4 sm:$0xff]   ;;  %v265_v15 = vld [vmem:[%s4022_s30 + $0x30] ss:$8 sps:$4 sm:$0xff]   ;;  %417 = vst.msk [vmem:[#allocation2 + $0x90] sm:$0xff] %vm397_vm0, %v343_v4  ;;  %419 = vst.msk [vmem:[#allocation2 + $0xa0] sm:$0xff] %vm397_vm0, %v345_v5  ;;  %v325_v18 = vunpack.c.l.bf16 %v253_v8  ;;  %v327_v19 = vunpack.c.h.bf16 %v253_v8  ;;  %v329_v22 = vunpack.c.l.bf16 %v257_v13  ;;  %v331_v23 = vunpack.c.h.bf16 %v257_v13 }
  0x15   : > { %421 = vst.msk [vmem:[#allocation2 + $0xb0] sm:$0xff] %vm397_vm0, %v347_v9  ;;  %423 = vst.msk [vmem:[#allocation2 + $0xc0] sm:$0xff] %vm397_vm0, %v349_v10  ;;  %v333_v24 = vunpack.c.l.bf16 %v261_v14  ;;  %v335_v25 = vunpack.c.h.bf16 %v261_v14  ;;  %v337_v26 = vunpack.c.l.bf16 %v265_v15  ;;  %v339_v27 = vunpack.c.h.bf16 %v265_v15  ;;  %v260_v56 = vld [vmem:[%s4022_s30 + $0x1c] sm:$0x1]  ;;  %v262_v57 = vld [vmem:[%s4022_s30 + $0x24] sm:$0x1] }
  0x16   : > { %425 = vst.msk [vmem:[#allocation2 + $0xd0] sm:$0xff] %vm397_vm0, %v351_v11  ;;  %427 = vst.msk [vmem:[#allocation2 + $0xe0] sm:$0xff] %vm397_vm0, %v353_v12  ;;  %v326_v28 = vunpack.c.l.bf16 %v254_v20  ;;  %v328_v29 = vunpack.c.l.bf16 %v256_v21  ;;  %v330_v37 = vunpack.c.l.bf16 %v258_v32  ;;  %v332_v60 = vunpack.c.l.bf16 %v260_v56  ;;  %v264_v61 = vld [vmem:[%s4022_s30 + $0x2c] sm:$0x1]  ;;  %v266_v63 = vld [vmem:[%s4022_s30 + $0x34] sm:$0x1] }
  0x17   : > { %429 = vst.msk [vmem:[#allocation2 + $0xf0] sm:$0xff] %vm397_vm0, %v355_v16  ;;  %431 = vst.msk [vmem:[#allocation2 + $0x100] sm:$0xff] %vm397_vm0, %v357_v17  ;;  %v334_v62 = vunpack.c.l.bf16 %v262_v57  ;;  %v268_v0 = vld [vmem:[%s4022_s30 + $0x3c] sm:$0x1]  ;;  %v336_v2 = vunpack.c.l.bf16 %v264_v61  ;;  %v338_v3 = vunpack.c.l.bf16 %v266_v63  ;;  %v289_v5 = vld [vmem:[%s4022_s30 + $0x90] ss:$8 sps:$4 sm:$0xff]  }
  0x18   : > { %398 = vst.msk [vmem:[#allocation2] sm:$0xff] %vm397_vm0, %v325_v18  ;;  %401 = vst.msk [vmem:[#allocation2 + $0x10] sm:$0xff] %vm397_vm0, %v327_v19  ;;  %v340_v4 = vunpack.c.l.bf16 %v268_v0  ;;  %v293_v6 = vld [vmem:[%s4022_s30 + $0xa0] ss:$8 sps:$4 sm:$0xff]   ;;  %v297_v7 = vld [vmem:[%s4022_s30 + $0xb0] ss:$8 sps:$4 sm:$0xff]   ;;  %v361_v8 = vunpack.c.l.bf16 %v289_v5  ;;  %v363_v9 = vunpack.c.h.bf16 %v289_v5 }
  0x19   : > { %403 = vst.msk [vmem:[#allocation2 + $0x20] sm:$0xff] %vm397_vm0, %v329_v22  ;;  %405 = vst.msk [vmem:[#allocation2 + $0x30] sm:$0xff] %vm397_vm0, %v331_v23  ;;  %v365_v10 = vunpack.c.l.bf16 %v293_v6  ;;  %v367_v11 = vunpack.c.h.bf16 %v293_v6  ;;  %v301_v12 = vld [vmem:[%s4022_s30 + $0xc0] ss:$8 sps:$4 sm:$0xff]   ;;  %v369_v15 = vunpack.c.l.bf16 %v297_v7  ;;  %v371_v16 = vunpack.c.h.bf16 %v297_v7  ;;  %v304_v61 = vld [vmem:[%s4022_s30 + $0xcc] sm:$0x1] }
  0x1a   : > { %407 = vst.msk [vmem:[#allocation2 + $0x40] sm:$0xff] %vm397_vm0, %v333_v24  ;;  %409 = vst.msk [vmem:[#allocation2 + $0x50] sm:$0xff] %vm397_vm0, %v335_v25  ;;  %v307_v13 = vld [vmem:[%s4022_s30 + $0xd8] ss:$8 sps:$4 sm:$0xff]   ;;  %v311_v14 = vld [vmem:[%s4022_s30 + $0xe8] ss:$8 sps:$4 sm:$0xff]   ;;  %v373_v17 = vunpack.c.l.bf16 %v301_v12  ;;  %v375_v18 = vunpack.c.h.bf16 %v301_v12 }
  0x1b   : > { %411 = vst.msk [vmem:[#allocation2 + $0x60] sm:$0xff] %vm397_vm0, %v337_v26  ;;  %413 = vst.msk [vmem:[#allocation2 + $0x70] sm:$0xff] %vm397_vm0, %v339_v27  ;;  %v486_v30 = vld [vmem:[#allocation2 + $0x90] sm:$0xff]  ;;  %v4052_v31 = vld [vmem:[#allocation2 + $0xa0] sm:$0xff]  ;;  %v379_v21 = vunpack.c.l.bf16 %v307_v13  ;;  %v381_v22 = vunpack.c.h.bf16 %v307_v13  ;;  %v383_v23 = vunpack.c.l.bf16 %v311_v14  ;;  %v385_v24 = vunpack.c.h.bf16 %v311_v14 }
  0x1c   : > { %400 = vst.msk [vmem:[#allocation2 + $0x8] sm:$0x1] %vm399_vm1, %v326_v28  ;;  %402 = vst.msk [vmem:[#allocation2 + $0x18] sm:$0x1] %vm399_vm1, %v328_v29  ;;  %v494_v33 = vpack.c.bf16 %v4052_v31, %v486_v30  ;;  %v4056_v34 = vld [vmem:[#allocation2 + $0xb0] sm:$0xff]  ;;  %v4058_v35 = vld [vmem:[#allocation2 + $0xc0] sm:$0xff] }
  0x1d   : > { %v4060_v36 = vld [vmem:[#allocation2 + $0xd0] sm:$0xff]  ;;  %v495_v38 = vpack.c.bf16 %v4058_v35, %v4056_v34  ;;  %v4064_v39 = vld [vmem:[#allocation2 + $0xe0] sm:$0xff]  ;;  %v1209_v42 = vpack.c.bf16 %v4056_v34, %v4052_v31  ;;  %404 = vst.msk [vmem:[#allocation2 + $0x28] sm:$0x1] %vm399_vm1, %v330_v37  ;;  %406 = vst.msk [vmem:[#allocation2 + $0x38] sm:$0x1] %vm399_vm1, %v332_v60 }
  0x1e   : > { %v4066_v40 = vld [vmem:[#allocation2 + $0xf0] sm:$0xff]  ;;  %v1210_v43 = vpack.c.bf16 %v4060_v36, %v4058_v35  ;;  %3413 = vmatprep.mubr.msk.bf16.mxu0 %vm397_vm0, %v494_v33  ;;  %v496_v44 = vpack.c.bf16 %v4064_v39, %v4060_v36  ;;  %v4088_v48 = vld [vmem:[#allocation2 + $0x100] sm:$0xff]  ;;  %408 = vst.msk [vmem:[#allocation2 + $0x48] sm:$0x1] %vm399_vm1, %v334_v62  ;;  %410 = vst.msk [vmem:[#allocation2 + $0x58] sm:$0x1] %vm399_vm1, %v336_v2  ;;  %v376_v2 = vunpack.c.l.bf16 %v304_v61 }
  0x1f   : > { %v4080_v45 = vld [vmem:[#allocation2 + $0x10] sm:$0xff]  ;;  %v1211_v47 = vpack.c.bf16 %v4066_v40, %v4064_v39  ;;  %3414 = vmatmul.mubr.msk.bf16.vlgmr.msra.gmra.mrb[0].mxu0 %vm397_vm0, %v495_v38  ;;  %v4098_v52 = vld [vmem:[#allocation2] sm:$0xff]  ;;  %v497_v59 = vpack.c.bf16 %v4088_v48, %v4066_v40  ;;  %412 = vst.msk [vmem:[#allocation2 + $0x68] sm:$0x1] %vm399_vm1, %v338_v3  ;;  %414 = vst.msk [vmem:[#allocation2 + $0x78] sm:$0x1] %vm399_vm1, %v340_v4 }
  0x20   : > { %v4082_v46 = vld [vmem:[#allocation2 + $0x20] sm:$0xff]  ;;  %v4090_v49 = vld [vmem:[#allocation2 + $0x30] sm:$0xff]  ;;  %3422 = vmatpush3.bf16.msra.mxu0 %v4013_v1  ;;  %3417 = vmatprep.mubr.msk.bf16.mxu0 %vm397_vm0, %v496_v44  ;;  %v479_v1 = vpack.c.bf16 %v4080_v45, %v4098_v52  ;;  %435 = vst.msk [vmem:[#allocation2 + $0x120] sm:$0xff] %vm397_vm0, %v361_v8  ;;  %437 = vst.msk [vmem:[#allocation2 + $0x130] sm:$0xff] %vm397_vm0, %v363_v9 }
  0x21   : > { %v4092_v50 = vld [vmem:[#allocation2 + $0x40] sm:$0xff]  ;;  %v1102_v51 = vpack.c.bf16 %v4082_v46, %v4080_v45  ;;  %v4100_v53 = vld [vmem:[#allocation2 + $0x50] sm:$0xff]  ;;  %3431 = vmatprep.subr.bf16.mxu0 %v4071_v41  ;;  %439 = vst.msk [vmem:[#allocation2 + $0x140] sm:$0xff] %vm397_vm0, %v365_v10  ;;  %441 = vst.msk [vmem:[#allocation2 + $0x150] sm:$0xff] %vm397_vm0, %v367_v11  ;;  %v480_v7 = vpack.c.bf16 %v4090_v49, %v4082_v46 }
  0x22   : > { %v4102_v54 = vld [vmem:[#allocation2 + $0x60] sm:$0xff]  ;;  %v1103_v55 = vpack.c.bf16 %v4092_v50, %v4090_v49  ;;  %v319_v20 = vld [vmem:[%s4022_s30 + $0x108] ss:$8 sps:$4 sm:$0xff]   ;;  %v290_v25 = vld [vmem:[%s4022_s30 + $0x94] sm:$0x1]  ;;  %443 = vst.msk [vmem:[#allocation2 + $0x160] sm:$0xff] %vm397_vm0, %v369_v15  ;;  %v481_v11 = vpack.c.bf16 %v4100_v53, %v4092_v50 }
  0x23   : > { %v1104_v58 = vpack.c.bf16 %v4102_v54, %v4100_v53  ;;  %v315_v19 = vld [vmem:[%s4022_s30 + $0xf8] ss:$8 sps:$4 sm:$0xff]   ;;  %v292_v26 = vld [vmem:[%s4022_s30 + $0x9c] sm:$0x1]  ;;  %v294_v27 = vld [vmem:[%s4022_s30 + $0xa4] sm:$0x1]  ;;  %v391_v32 = vunpack.c.l.bf16 %v319_v20  ;;  %v393_v33 = vunpack.c.h.bf16 %v319_v20  ;;  %v362_v52 = vunpack.c.l.bf16 %v290_v25 }
  0x24   : > { %v4139_v28 = vld [vmem:[#allocation2 + $0x11] sm:$0xff]  ;;  %445 = vst.msk [vmem:[#allocation2 + $0x170] sm:$0xff] %vm397_vm0, %v371_v16  ;;  %447 = vst.msk [vmem:[#allocation2 + $0x180] sm:$0xff] %vm397_vm0, %v373_v17  ;;  %v387_v29 = vunpack.c.l.bf16 %v315_v19  ;;  %v389_v30 = vunpack.c.h.bf16 %v315_v19  ;;  %v296_v37 = vld [vmem:[%s4022_s30 + $0xac] sm:$0x1]  ;;  %v364_v56 = vunpack.c.l.bf16 %v292_v26  ;;  %v366_v57 = vunpack.c.l.bf16 %v294_v27 }
  0x25   : > { %449 = vst.msk [vmem:[#allocation2 + $0x190] sm:$0xff] %vm397_vm0, %v375_v18  ;;  %v298_v38 = vld [vmem:[%s4022_s30 + $0xb4] sm:$0x1]  ;;  %v300_v44 = vld [vmem:[%s4022_s30 + $0xbc] sm:$0x1]  ;;  %453 = vst.msk [vmem:[#allocation2 + $0x1b0] sm:$0xff] %vm397_vm0, %v379_v21 }
  0x26   : > { %455 = vst.msk [vmem:[#allocation2 + $0x1c0] sm:$0xff] %vm397_vm0, %v381_v22  ;;  %457 = vst.msk [vmem:[#allocation2 + $0x1d0] sm:$0xff] %vm397_vm0, %v383_v23  ;;  %v302_v60 = vld [vmem:[%s4022_s30 + $0xc4] sm:$0x1]  ;;  %v370_v63 = vunpack.c.l.bf16 %v298_v38  ;;  %v372_v0 = vunpack.c.l.bf16 %v300_v44  ;;  %v269_v3 = vld [vmem:[%s4022_s30 + $0x40] ss:$72 sps:$4 sm:$0xff]  }
  0x27   : > { %3418 = vmatmul.mubr.msk.bf16.gmra.mrb[4].mxu0 %vm397_vm0, %v497_v59  ;;  %459 = vst.msk [vmem:[#allocation2 + $0x1e0] sm:$0xff] %vm397_vm0, %v385_v24  ;;  %v368_v59 = vunpack.c.l.bf16 %v296_v37  ;;  %v4155_v62 = vld [vmem:[#allocation2 + $0x21] sm:$0xff]  ;;  %461 = vst.msk [vmem:[#allocation2 + $0x1f0] sm:$0xff] %vm397_vm0, %v387_v29  ;;  %v341_v4 = vunpack.c.l.bf16 %v269_v3  ;;  %v359_v5 = vunpack.c.h.bf16 %v269_v3  ;;  %v4170_v8 = vld [vmem:[#allocation2 + $0x31] sm:$0xff] }
  0x28   : > { %3423 = vmatprep.mubr.msk.bf16.mxu0 %vm397_vm0, %v479_v1  ;;  %463 = vst.msk [vmem:[#allocation2 + $0x200] sm:$0xff] %vm397_vm0, %v389_v30  ;;  %465 = vst.msk [vmem:[#allocation2 + $0x210] sm:$0xff] %vm397_vm0, %v391_v32  ;;  %v374_v1 = vunpack.c.l.bf16 %v302_v60  ;;  %v1315_v6 = vpack.c.bf16 %v4155_v62, %v4139_v28  ;;  %v4172_v9 = vld [vmem:[#allocation2 + $0x41] sm:$0xff]  ;;  %v4181_v12 = vld [vmem:[#allocation2 + $0x51] sm:$0xff]  ;;  %v676_v23 = vpack.c.bf16 %v4170_v8, %v4155_v62 }
  0x29   : > { %467 = vst.msk [vmem:[#allocation2 + $0x220] sm:$0xff] %vm397_vm0, %v393_v33  ;;  %v270_v10 = vld [vmem:[%s4022_s30 + $0x44] sm:$0x1]  ;;  %415 = vst.msk [vmem:[#allocation2 + $0x80] sm:$0xff] %vm397_vm0, %v341_v4  ;;  %v1316_v14 = vpack.c.bf16 %v4172_v9, %v4170_v8  ;;  %v3876_v16 = vld [vmem:[%s4681_s1 + $0x18] sm:$0xff]   ;;  %v677_v25 = vpack.c.bf16 %v4181_v12, %v4172_v9 }
  0x2a   : > { %436 = vst.msk [vmem:[#allocation2 + $0x128] sm:$0x1] %vm399_vm1, %v362_v52  ;;  %438 = vst.msk [vmem:[#allocation2 + $0x138] sm:$0x1] %vm399_vm1, %v364_v56  ;;  %v4183_v13 = vld [vmem:[#allocation2 + $0x61] sm:$0xff]  ;;  %v342_v15 = vunpack.c.l.bf16 %v270_v10  ;;  %v4198_v18 = vld [vmem:[#allocation2 + $0x70] sm:$0xff] }
  0x2b   : > { %440 = vst.msk [vmem:[#allocation2 + $0x148] sm:$0x1] %vm399_vm1, %v366_v57  ;;  %442 = vst.msk [vmem:[#allocation2 + $0x158] sm:$0x1] %vm399_vm1, %v368_v59  ;;  %v1317_v17 = vpack.c.bf16 %v4183_v13, %v4181_v12  ;;  %v667_v19 = vld [vmem:[#allocation2 + $0x1] sm:$0xff]  ;;  %v482_v20 = vpack.c.bf16 %v4198_v18, %v4102_v54  ;;  %v3887_v24 = vld [vmem:[%s4682_s2 + $0x90] sm:$0xff]  }
  0x2c   : > { %444 = vst.msk [vmem:[#allocation2 + $0x168] sm:$0x1] %vm399_vm1, %v370_v63  ;;  %446 = vst.msk [vmem:[#allocation2 + $0x178] sm:$0x1] %vm399_vm1, %v372_v0  ;;  %v675_v21 = vpack.c.bf16 %v4139_v28, %v667_v19  ;;  %v3883_v22 = vld [vmem:[%s4682_s2 + $0x80] sm:$0xff]   ;;  %v3889_v27 = vld [vmem:[%s4682_s2 + $0x98] sm:$0xff]  }
  0x2d   : > { %448 = vst.msk [vmem:[#allocation2 + $0x188] sm:$0x1] %vm399_vm1, %v374_v1  ;;  %450 = vst.msk [vmem:[#allocation2 + $0x198] sm:$0x1] %vm399_vm1, %v376_v2  ;;  %3549 = vmatprep.subr.bf16.mxu1 %v3883_v22  ;;  %v3877_v26 = vld [vmem:[%s4681_s1 + $0x20] sm:$0xff]   ;;  %v4224_v29 = vld [vmem:[#allocation2 + $0x71] sm:$0xff] }
  0x2e   : > { %433 = vst.msk [vmem:[#allocation2 + $0x110] sm:$0xff] %vm397_vm0, %v359_v5  ;;  %3550 = vmatpush3.bf16.msra.mxu1 %v3883_v22  ;;  %v774_v30 = vld [vmem:[#allocation2 + $0x120] sm:$0xff]  ;;  %v775_v32 = vld [vmem:[#allocation2 + $0x130] sm:$0xff]  ;;  %v678_v33 = vpack.c.bf16 %v4224_v29, %v4183_v13  ;;  %v3878_v59 = vld [vmem:[%s4681_s1 + $0x28] sm:$0xff]  }
  0x2f   : > { %416 = vst.msk [vmem:[#allocation2 + $0x88] sm:$0x1] %vm399_vm1, %v342_v15  ;;  %3424 = vmatmul.mubr.msk.bf16.vlgmr.msra.gmra.mrb[0].mxu0 %vm397_vm0, %v480_v7  ;;  %v782_v37 = vpack.c.bf16 %v775_v32, %v774_v30  ;;  %v776_v38 = vld [vmem:[#allocation2 + $0x140] sm:$0xff]  ;;  %v777_v44 = vld [vmem:[#allocation2 + $0x150] sm:$0xff]  ;;  %v3884_v34 = vld [vmem:[%s4682_s2 + $0x48] sm:$0xff]  }
  0x30   : > { %3432 = vmatpush3.bf16.msra.mxu0 %v4071_v41  ;;  %3427 = vmatprep.mubr.msk.bf16.mxu0 %vm397_vm0, %v481_v11  ;;  %v3885_v41 = vld [vmem:[%s4682_s2 + $0x88] sm:$0xff]   ;;  %v778_v52 = vld [vmem:[#allocation2 + $0x160] sm:$0xff]  ;;  %v779_v56 = vld [vmem:[#allocation2 + $0x170] sm:$0xff]  ;;  %v783_v57 = vpack.c.bf16 %v777_v44, %v776_v38 }
  0x31   : > { %3441 = vmatprep.subr.bf16.mxu0 %v3876_v16  ;;  %3551 = vmatprep.subr.bf16.mxu1 %v3885_v41  ;;  %v784_v60 = vpack.c.bf16 %v779_v56, %v778_v52  ;;  %v780_v61 = vld [vmem:[#allocation2 + $0x180] sm:$0xff]  ;;  %v781_v63 = vld [vmem:[#allocation2 + $0x190] sm:$0xff]  ;;  %v3888_v40 = vld [vmem:[%s4682_s2 + $0x58] sm:$0xff]  }
  0x32   : > { %3552 = vmatpush3.bf16.msra.mxu1 %v3885_v41  ;;  %v881_v0 = vld [vmem:[#allocation2 + $0x1b0] sm:$0xff]  ;;  %v882_v1 = vld [vmem:[#allocation2 + $0x1c0] sm:$0xff]  ;;  %v785_v2 = vpack.c.bf16 %v781_v63, %v780_v61  ;;  %v3896_v53 = vld [vmem:[%s4682_s2 + $0x78] sm:$0xff]  }
  0x33   : > { %3553 = vmatprep.subr.bf16.mxu1 %v3887_v24  ;;  %v889_v3 = vpack.c.bf16 %v882_v1, %v881_v0  ;;  %v883_v4 = vld [vmem:[#allocation2 + $0x1d0] sm:$0xff]  ;;  %v884_v5 = vld [vmem:[#allocation2 + $0x1e0] sm:$0xff] }
  0x34   : > { %v885_v7 = vld [vmem:[#allocation2 + $0x1f0] sm:$0xff]  ;;  %v886_v10 = vld [vmem:[#allocation2 + $0x200] sm:$0xff]  ;;  %v890_v11 = vpack.c.bf16 %v884_v5, %v883_v4  ;;  %v3900_v4 = vld [vmem:[%s4682_s2 + $0x8] sm:$0xff]  }
  0x35   : > { %v3879_v15 = vld [vmem:[%s4681_s1 + $0x30] sm:$0xff]   ;;  %v3881_v52 = vld [vmem:[%s4681_s1 + $0x40] sm:$0xff]  }
  0x36   : > { %3554 = vmatpush3.bf16.msra.mxu1 %v3887_v24  ;;  %v887_v19 = vld [vmem:[#allocation2 + $0x210] sm:$0xff]  ;;  %v989_v24 = vld [vmem:[#allocation2 + $0x141] sm:$0xff]  ;;  %v3043_v62 = vld [vmem:[%s4683_s3] ss:$0 sm:$0xff] }
  0x37   : > { %3428 = vmatmul.mubr.msk.bf16.gmra.mrb[4].mxu0 %vm397_vm0, %v482_v20  ;;  %3555 = vmatprep.subr.bf16.mxu1 %v3889_v27  ;;  %v888_v20 = vld [vmem:[#allocation2 + $0x220] sm:$0xff]  ;;  %v988_v22 = vld [vmem:[#allocation2 + $0x131] sm:$0xff] }
  0x38   : > { %3433 = vmatprep.mubr.msk.bf16.mxu0 %vm397_vm0, %v675_v21  ;;  %v987_v21 = vld [vmem:[#allocation2 + $0x121] sm:$0xff]  ;;  %v892_v41 = vpack.c.bf16 %v888_v20, %v887_v19  ;;  %v994_v38 = vld [vmem:[#allocation2 + $0x191] sm:$0xff]  ;;  %v3044_v8 = vld [vmem:[%s4684_s4] ss:$0 sm:$0xff] }
  0x39   : > { %v1101_v56 = vld [vmem:[#allocation2 + $0x80] sm:$0xff]  ;;  %v1208_v49 = vld [vmem:[#allocation2 + $0x110] sm:$0xff] }
  0x3a   : > { %3556 = vmatpush3.bf16.msra.mxu1 %v3889_v27  ;;  %v992_v27 = vld [vmem:[#allocation2 + $0x171] sm:$0xff]  ;;  %v1105_v45 = vpack.c.bf16 %v1101_v56, %v4198_v18  ;;  %v3882_v46 = vld [vmem:[%s4682_s2 + $0x40] sm:$0xff]   ;;  %v1212_v31 = vpack.c.bf16 %v1208_v49, %v4088_v48 }
  0x3b   : > { %v1314_v35 = vld [vmem:[#allocation2 + $0x81] sm:$0xff]  ;;  %v3886_v36 = vld [vmem:[%s4682_s2 + $0x50] sm:$0xff]   ;;  %v3904_v49 = vld [vmem:[%s4682_s2 + $0x18] sm:$0xff]  }
  0x3c   : > { %v1318_v39 = vpack.c.bf16 %v1314_v35, %v4224_v29  ;;  %v3891_v48 = vld [vmem:[%s4682_s2 + $0xa0] sm:$0xff]   ;;  %v3894_v50 = vld [vmem:[%s4682_s2 + $0x70] sm:$0xff]  }
  0x3d   : > { %3557 = vmatprep.subr.bf16.mxu1 %v3891_v48  ;;  %v3895_v54 = vld [vmem:[%s4682_s2 + $0xb0] sm:$0xff]   ;;  %v4359_v28 = vld [vmem:[%s4682_s2 + $0xc0] sm:$0xff]  }
  0x3e   : > { %3558 = vmatpush3.bf16.msra.mxu1 %v3891_v48 }
  0x3f   : > { %3434 = vmatmul.mubr.msk.bf16.vlgmr.msra.gmra.mrb[0].mxu0 %vm397_vm0, %v676_v23  ;;  %v995_v23 = vpack.c.bf16 %v988_v22, %v987_v21 }
  0x40   : > { %3442 = vmatpush3.bf16.msra.mxu0 %v3876_v16  ;;  %3437 = vmatprep.mubr.msk.bf16.mxu0 %vm397_vm0, %v677_v25  ;;  %v891_v16 = vpack.c.bf16 %v886_v10, %v885_v7  ;;  %v990_v25 = vld [vmem:[#allocation2 + $0x151] sm:$0xff] }
  0x41   : > { %3451 = vmatprep.subr.bf16.mxu0 %v3877_v26  ;;  %v996_v30 = vpack.c.bf16 %v990_v25, %v989_v24  ;;  %v3902_v25 = vld [vmem:[%s4682_s2 + $0x10] sm:$0xff]  }
  0x47   : > { %3438 = vmatmul.mubr.msk.bf16.gmra.mrb[4].mxu0 %vm397_vm0, %v678_v33  ;;  %v3880_v33 = vld [vmem:[%s4681_s1 + $0x38] sm:$0xff]  }
  0x48   : > { %3443 = vmatprep.mubr.msk.bf16.mxu0 %vm397_vm0, %v782_v37  ;;  %v993_v37 = vld [vmem:[#allocation2 + $0x181] sm:$0xff] }
  0x49   : > { %v998_v44 = vpack.c.bf16 %v994_v38, %v993_v37 }
  0x4f   : > { %3444 = vmatmul.mubr.msk.bf16.vlgmr.msra.gmra.mrb[0].mxu0 %vm397_vm0, %v783_v57 }
  0x50   : > { %3452 = vmatpush3.bf16.msra.mxu0 %v3877_v26  ;;  %3447 = vmatprep.mubr.msk.bf16.mxu0 %vm397_vm0, %v784_v60  ;;  %v991_v26 = vld [vmem:[#allocation2 + $0x161] sm:$0xff] }
  0x51   : > { %3461 = vmatprep.subr.bf16.mxu0 %v3878_v59  ;;  %v997_v32 = vpack.c.bf16 %v992_v27, %v991_v26 }
  0x57   : > { %3448 = vmatmul.mubr.msk.bf16.gmra.mrb[4].mxu0 %vm397_vm0, %v785_v2 }
  0x58   : > { %3453 = vmatprep.mubr.msk.bf16.mxu0 %vm397_vm0, %v889_v3 }
  0x5f   : > { %3454 = vmatmul.mubr.msk.bf16.vlgmr.msra.gmra.mrb[0].mxu0 %vm397_vm0, %v890_v11 }
  0x60   : > { %3462 = vmatpush3.bf16.msra.mxu0 %v3878_v59  ;;  %3457 = vmatprep.mubr.msk.bf16.mxu0 %vm397_vm0, %v891_v16 }
  0x61   : > { %3471 = vmatprep.subr.bf16.mxu0 %v3879_v15 }
  0x67   : > { %3458 = vmatmul.mubr.msk.bf16.gmra.mrb[4].mxu0 %vm397_vm0, %v892_v41 }
  0x68   : > { %3463 = vmatprep.mubr.msk.bf16.mxu0 %vm397_vm0, %v995_v23 }
  0x6f   : > { %3464 = vmatmul.mubr.msk.bf16.vlgmr.msra.gmra.mrb[0].mxu0 %vm397_vm0, %v996_v30 }
  0x70   : > { %3472 = vmatpush3.bf16.msra.mxu0 %v3879_v15  ;;  %3467 = vmatprep.mubr.msk.bf16.mxu0 %vm397_vm0, %v997_v32 }
  0x71   : > { %3481 = vmatprep.subr.bf16.mxu0 %v3880_v33 }
  0x77   : > { %3468 = vmatmul.mubr.msk.bf16.gmra.mrb[4].mxu0 %vm397_vm0, %v998_v44 }
  0x78   : > { %3473 = vmatprep.mubr.msk.bf16.mxu0 %vm397_vm0, %v1102_v51  ;;  %v3893_v51 = vld [vmem:[%s4682_s2 + $0xa8] sm:$0xff]  }
  0x79   : > { %3559 = vmatprep.subr.bf16.mxu1 %v3893_v51 }
  0x7a   : > { %3560 = vmatpush3.bf16.msra.mxu1 %v3893_v51 }
  0x7b   : > { %3561 = vmatprep.subr.bf16.mxu1 %v3895_v54 }
  0x7e   : > { %3562 = vmatpush3.bf16.msra.mxu1 %v3895_v54 }
  0x7f   : > { %3474 = vmatmul.mubr.msk.bf16.vlgmr.msra.gmra.mrb[0].mxu0 %vm397_vm0, %v1103_v55  ;;  %v3898_v55 = vld [vmem:[%s4682_s2] sm:$0xff]  }
  0x80   : > { %3482 = vmatpush3.bf16.msra.mxu0 %v3880_v33  ;;  %3477 = vmatprep.mubr.msk.bf16.mxu0 %vm397_vm0, %v1104_v58  ;;  %v3897_v58 = vld [vmem:[%s4682_s2 + $0xb8] sm:$0xff]  }
  0x81   : > { %3491 = vmatprep.subr.bf16.mxu0 %v3881_v52  ;;  %3563 = vmatprep.subr.bf16.mxu1 %v3897_v58 }
  0x82   : > { %3564 = vmatpush3.bf16.msra.mxu1 %v3897_v58 }
  0x83   : > { %3573 = vmatprep.subr.bf16.mxu1 %v4359_v28 }
  0x87   : > { %3478 = vmatmul.mubr.msk.bf16.gmra.mrb[4].mxu0 %vm397_vm0, %v1105_v45  ;;  %v3901_v45 = vld [vmem:[%s4682_s2 + $0xc8] sm:$0xff]  }
  0x88   : > { %3483 = vmatprep.mubr.msk.bf16.mxu0 %vm397_vm0, %v1209_v42  ;;  %v3890_v42 = vld [vmem:[%s4682_s2 + $0x60] sm:$0xff]  }
  0x8f   : > { %3484 = vmatmul.mubr.msk.bf16.vlgmr.msra.gmra.mrb[0].mxu0 %vm397_vm0, %v1210_v43  ;;  %v3892_v43 = vld [vmem:[%s4682_s2 + $0x68] sm:$0xff]  }
  0x90   : > { %3492 = vmatpush3.bf16.msra.mxu0 %v3881_v52  ;;  %3487 = vmatprep.mubr.msk.bf16.mxu0 %vm397_vm0, %v1211_v47  ;;  %v3963_v47 = vmov 0.0  }
  0x91   : > { %3501 = vmatprep.subr.bf16.mxu0 %v3882_v46  ;;  %1449 = vst [vmem:[#allocation3 + $0x30] sm:$0xff] %v3963_v47  ;;  %1450 = vst [vmem:[#allocation3 + $0x38] sm:$0x3] %v3963_v47 }
  0x92   : > { %1443 = vst [vmem:[#allocation3] sm:$0xff] %v3963_v47  ;;  %1444 = vst [vmem:[#allocation3 + $0x8] sm:$0x3] %v3963_v47 }
  0x93   : > { %1445 = vst [vmem:[#allocation3 + $0x10] sm:$0xff] %v3963_v47  ;;  %1446 = vst [vmem:[#allocation3 + $0x18] sm:$0x3] %v3963_v47 }
  0x94   : > { %1447 = vst [vmem:[#allocation3 + $0x20] sm:$0xff] %v3963_v47  ;;  %1448 = vst [vmem:[#allocation3 + $0x28] sm:$0x3] %v3963_v47 }
  0x95   : > { %1451 = vst [vmem:[#allocation3 + $0x40] sm:$0xff] %v3963_v47  ;;  %1452 = vst [vmem:[#allocation3 + $0x48] sm:$0x3] %v3963_v47 }
  0x96   : > { %1453 = vst [vmem:[#allocation3 + $0x50] sm:$0xff] %v3963_v47  ;;  %1454 = vst [vmem:[#allocation3 + $0x58] sm:$0x3] %v3963_v47 }
  0x97   : > { %3488 = vmatmul.mubr.msk.bf16.gmra.mrb[4].mxu0 %vm397_vm0, %v1212_v31  ;;  %1455 = vst [vmem:[#allocation3 + $0x60] sm:$0xff] %v3963_v47  ;;  %1456 = vst [vmem:[#allocation3 + $0x68] sm:$0x3] %v3963_v47 }
  0x98   : > { %3493 = vmatprep.mubr.msk.bf16.mxu0 %vm397_vm0, %v1315_v6  ;;  %1457 = vst [vmem:[#allocation3 + $0x70] sm:$0xff] %v3963_v47  ;;  %1458 = vst [vmem:[#allocation3 + $0x78] sm:$0x3] %v3963_v47 }
  0x99   : > { %1459 = vst [vmem:[#allocation3 + $0x80] sm:$0xff] %v3963_v47  ;;  %1460 = vst [vmem:[#allocation3 + $0x88] sm:$0x3] %v3963_v47  ;;  %v1500_v57 = vld [vmem:[#allocation3 + $0x1] sm:$0xff] }
  0x9a   : > { %1461 = vst [vmem:[#allocation3 + $0x90] sm:$0xff] %v3963_v47  ;;  %1462 = vst [vmem:[#allocation3 + $0x98] sm:$0x3] %v3963_v47  ;;  %v1755_v21 = vld [vmem:[#allocation3 + $0x2] sm:$0xff] }
  0x9f   : > { %3494 = vmatmul.mubr.msk.bf16.vlgmr.msra.gmra.mrb[0].mxu0 %vm397_vm0, %v1316_v14 }
  0xa0   : > { %3497 = vmatprep.mubr.msk.bf16.mxu0 %vm397_vm0, %v1317_v17  ;;  %3502 = vmatpush3.bf16.msra.mxu0 %v3882_v46 }
  0xa1   : > { %3503 = vmatprep.subr.bf16.mxu0 %v3884_v34 }
  0xa4   : > { %3504 = vmatpush3.bf16.msra.mxu0 %v3884_v34 }
  0xa5   : > { %3505 = vmatprep.subr.bf16.mxu0 %v3886_v36 }
  0xa7   : > { %3498 = vmatmul.mubr.msk.bf16.gmra.mrb[4].mxu0 %vm397_vm0, %v1318_v39 }
  0xa8   : > { %3506 = vmatpush3.bf16.msra.mxu0 %v3886_v36  ;;  %v3903_v36 = vld [vmem:[%s4682_s2 + $0xd0] sm:$0xff]  }
  0xa9   : > { %3507 = vmatprep.subr.bf16.mxu0 %v3888_v40 }
  0xac   : > { %3508 = vmatpush3.bf16.msra.mxu0 %v3888_v40  ;;  %v3906_v40 = vld [vmem:[%s4682_s2 + $0x20] sm:$0xff]  }
  0xad   : > { %3509 = vmatprep.subr.bf16.mxu0 %v3890_v42 }
  0xb0   : > { %3510 = vmatpush3.bf16.msra.mxu0 %v3890_v42 }
  0xb1   : > { %3511 = vmatprep.subr.bf16.mxu0 %v3892_v43 }
  0xb4   : > { %3512 = vmatpush3.bf16.msra.mxu0 %v3892_v43 }
  0xb5   : > { %3513 = vmatprep.subr.bf16.mxu0 %v3894_v50 }
  0xb8   : > { %3514 = vmatpush3.bf16.msra.mxu0 %v3894_v50 }
  0xb9   : > { %3515 = vmatprep.subr.bf16.mxu0 %v3896_v53 }
  0xbc   : > { %3516 = vmatpush3.bf16.msra.mxu0 %v3896_v53  ;;  %v3905_v53 = vld [vmem:[%s4682_s2 + $0xd8] sm:$0xff]  }
  0xbd   : > { %3525 = vmatprep.subr.bf16.mxu0 %v3898_v55 }
 0x172   : > { %v3495_v6 = vpop.f32.mrb[0].mxu0 }
 0x173   : > { %v1422_v9 = vmul.f32 %v3495_v6, %v3043_v62  ;;  %v1374_v12 = vpop.f32.mrb[1].mxu0  ;;  %v3909_v6 = vld [vmem:[%s4682_s2 + $0xe8] sm:$0xff]  }
 0x174   : > { %v1420_v13 = vmul.f32 %v3043_v62, %v1374_v12  ;;  %v3496_v14 = vpop.f32.mrb[2].mxu0 }
 0x175   : > { %v4368_v17 = vadd.f32 %v3044_v8, %v1422_v9  ;;  %v1423_v18 = vmul.f32 %v3496_v14, %v3043_v62  ;;  %v1377_v29 = vpop.f32.mrb[3].mxu0  ;;  %v3911_v9 = vld [vmem:[%s4682_s2 + $0xf0] sm:$0xff]  }
 0x176   : > { %v4370_v59 = vadd.f32 %v3044_v8, %v1420_v13  ;;  %v1421_v60 = vmul.f32 %v3043_v62, %v1377_v29  ;;  %v3913_v13 = vld [vmem:[%s4682_s2 + $0xf8] sm:$0xff]  }
 0x177   : > { %1466 = vst [vmem:[#allocation3 + $0x31] sm:$0xff] %v4368_v17  ;;  %v4373_v61 = vadd.f32 %v3044_v8, %v1423_v18 }
 0x178   : > { %1464 = vst [vmem:[#allocation3 + $0x11] sm:$0xff] %v4370_v59  ;;  %v4376_v63 = vadd.f32 %v3044_v8, %v1421_v60  ;;  %v1508_v0 = vpack.c.bf16 %v4370_v59, %v1500_v57  ;;  %v3914_v60 = vld [vmem:[%s4682_s2 + $0x100] sm:$0xff]  }
 0x179   : > { %1467 = vst [vmem:[#allocation3 + $0x41] sm:$0xff] %v4373_v61  ;;  %v2064_v1 = vpack.c.bf16 %v4373_v61, %v4368_v17 }
 0x17a   : > { %1465 = vst [vmem:[#allocation3 + $0x21] sm:$0xff] %v4376_v63  ;;  %v3499_v2 = vpop.f32.mrb[4].mxu0  ;;  %3517 = vmatprep.mubr.bf16.mxu0 %v1508_v0  ;;  %v4385_v3 = vpack.c.bf16 %v4368_v17, %v4376_v63  ;;  %v2063_v5 = vpack.c.bf16 %v4376_v63, %v4370_v59  ;;  %v3920_v59 = vld [vmem:[%s4682_s2 + $0x130] sm:$0xff]   ;;  %v3921_v63 = vld [vmem:[%s4682_s2 + $0x138] sm:$0xff]   ;;  %v2813_v17 = vld [vmem:[#allocation2 + $0x220] sm:$0xff] }
 0x17b   : > { %v1426_v7 = vmul.f32 %v3499_v2, %v3043_v62  ;;  %v1390_v10 = vpop.f32.mrb[5].mxu0 }
 0x17c   : > { %v1424_v11 = vmul.f32 %v3043_v62, %v1390_v10  ;;  %v3500_v15 = vpop.f32.mrb[6].mxu0  ;;  %3518 = vmatmul.mubr.bf16.vlgmr.msra.gmra.mrb[8].mxu0 %v4385_v3 }
 0x17d   : > { %v4393_v16 = vadd.f32 %v3044_v8, %v1426_v7  ;;  %v1427_v19 = vmul.f32 %v3500_v15, %v3043_v62  ;;  %v1393_v20 = vpop.f32.mrb[7].mxu0  ;;  %3526 = vmatpush3.bf16.msra.mxu0 %v3898_v55  ;;  %v3908_v55 = vld [vmem:[%s4682_s2 + $0x28] sm:$0xff]   ;;  %v3916_v15 = vld [vmem:[%s4682_s2 + $0x110] sm:$0xff]  }
 0x17e   : > { %v4395_v22 = vadd.f32 %v3044_v8, %v1424_v11  ;;  %v1425_v41 = vmul.f32 %v3043_v62, %v1393_v20  ;;  %3527 = vmatprep.subr.bf16.mxu0 %v3900_v4  ;;  %v4409_v30 = vld [vmem:[#allocation3 + $0x32] sm:$0xff] }
 0x17f   : > { %1470 = vst [vmem:[#allocation3 + $0x71] sm:$0xff] %v4393_v16  ;;  %v4398_v23 = vadd.f32 %v3044_v8, %v1427_v19  ;;  %v4400_v24 = vld [vmem:[#allocation3 + $0x12] sm:$0xff] }
 0x180   : > { %1468 = vst [vmem:[#allocation3 + $0x51] sm:$0xff] %v4395_v22  ;;  %v4406_v26 = vadd.f32 %v3044_v8, %v1425_v41  ;;  %v1763_v27 = vpack.c.bf16 %v4400_v24, %v1755_v21  ;;  %v4413_v32 = vpack.c.bf16 %v4395_v22, %v4373_v61  ;;  %v4415_v33 = vld [vmem:[#allocation3 + $0x42] sm:$0xff]  ;;  %v1473_v38 = vld [vmem:[#allocation3 + $0x10] sm:$0xff]  ;;  %v3912_v8 = vld [vmem:[%s4682_s2 + $0x38] sm:$0xff]  }
 0x181   : > { %1471 = vst [vmem:[#allocation3 + $0x81] sm:$0xff] %v4398_v23  ;;  %v4418_v37 = vld [vmem:[#allocation3 + $0x22] sm:$0xff]  ;;  %3528 = vmatpush3.bf16.msra.mxu0 %v3900_v4  ;;  %v2066_v44 = vpack.c.bf16 %v4398_v23, %v4393_v16  ;;  %v2214_v52 = vpack.c.bf16 %v4415_v33, %v4409_v30  ;;  %v1480_v35 = vpack.c.bf16 %v1473_v38, %v3963_v47  ;;  %v3910_v62 = vld [vmem:[%s4682_s2 + $0x30] sm:$0xff]   ;;  %v3917_v21 = vld [vmem:[%s4682_s2 + $0x118] sm:$0xff]  }
 0x182   : > { %1469 = vst [vmem:[#allocation3 + $0x61] sm:$0xff] %v4406_v26  ;;  %3565 = vmatprep.mubr.bf16.mxu1 %v1763_v27  ;;  %v4427_v56 = vpack.c.bf16 %v4409_v30, %v4418_v37  ;;  %3521 = vmatprep.mubr.bf16.mxu0 %v4413_v32  ;;  %v4435_v46 = vpack.c.bf16 %v4393_v16, %v4406_v26  ;;  %v1906_v43 = vld [vmem:[#allocation3 + $0x20] sm:$0xff]  ;;  %v1475_v14 = vld [vmem:[#allocation3 + $0x30] sm:$0xff]  ;;  %v3915_v4 = vld [vmem:[%s4682_s2 + $0x108] sm:$0xff]  }
 0x183   : > { %3529 = vmatprep.subr.bf16.mxu0 %v3902_v25  ;;  %v2065_v31 = vpack.c.bf16 %v4406_v26, %v4395_v22  ;;  %v2213_v34 = vpack.c.bf16 %v4418_v37, %v4400_v24  ;;  %v1913_v54 = vpack.c.bf16 %v1906_v43, %v1473_v38  ;;  %v4496_v18 = vpack.c.bf16 %v1475_v14, %v1906_v43  ;;  %v1908_v29 = vld [vmem:[#allocation3 + $0x40] sm:$0xff]  ;;  %v2806_v38 = vld [vmem:[#allocation2 + $0x1b0] sm:$0xff]  ;;  %v3925_v61 = vld [vmem:[%s4682_s2 + $0x158] sm:$0xff]  }
 0x184   : > { %3566 = vmatmul.mubr.bf16.vlgmr.msra.gmra.mrb[0].mxu1 %v4427_v56  ;;  %3522 = vmatmul.mubr.bf16.gmra.mrb[12].mxu0 %v4435_v46  ;;  %v1914_v2 = vpack.c.bf16 %v1908_v29, %v1475_v14  ;;  %v3918_v41 = vld [vmem:[%s4682_s2 + $0x120] sm:$0xff]   ;;  %v3927_v26 = vld [vmem:[%s4682_s2 + $0x168] sm:$0xff]   ;;  %v3928_v16 = vld [vmem:[%s4682_s2 + $0x170] sm:$0xff]  }
 0x185   : > { %3574 = vmatpush3.bf16.msra.mxu1 %v4359_v28  ;;  %3530 = vmatpush3.bf16.msra.mxu0 %v3902_v25  ;;  %v3907_v28 = vld [vmem:[%s4682_s2 + $0xe0] sm:$0xff]   ;;  %v3919_v25 = vld [vmem:[%s4682_s2 + $0x128] sm:$0xff]   ;;  %v3929_v24 = vld [vmem:[%s4682_s2 + $0x178] sm:$0xff]  }
 0x186   : > { %3575 = vmatprep.subr.bf16.mxu1 %v3901_v45  ;;  %3541 = vmatprep.mubr.bf16.mxu0 %v1480_v35  ;;  %v4462_v50 = vld [vmem:[#allocation3 + $0x72] sm:$0xff]  ;;  %v3951_v27 = vld [vmem:[%s4685_s5] sm:$0xff]   ;;  %v3923_v35 = vld [vmem:[%s4682_s2 + $0x148] sm:$0xff]  }
 0x187   : > { %v4451_v39 = vld [vmem:[#allocation3 + $0x52] sm:$0xff]  ;;  %3531 = vmatprep.subr.bf16.mxu0 %v3904_v49  ;;  %v3926_v22 = vld [vmem:[%s4682_s2 + $0x160] sm:$0xff]  }
 0x188   : > { %v4458_v42 = vpack.c.bf16 %v4451_v39, %v4415_v33  ;;  %v1477_v12 = vld [vmem:[#allocation3 + $0x50] sm:$0xff]  ;;  %v4514_v19 = vld [vmem:[#allocation3 + $0x80] sm:$0xff]  ;;  %v3933_v30 = vld [vmem:[%s4682_s2 + $0x198] sm:$0xff]  }
 0x189   : > { %3576 = vmatpush3.bf16.msra.mxu1 %v3901_v45  ;;  %v4460_v48 = vld [vmem:[#allocation3 + $0x62] sm:$0xff]  ;;  %3532 = vmatpush3.bf16.msra.mxu0 %v3904_v49  ;;  %v4498_v57 = vpack.c.bf16 %v1477_v12, %v1908_v29  ;;  %v1479_v10 = vld [vmem:[#allocation3 + $0x70] sm:$0xff] }
 0x18a   : > { %3569 = vmatprep.mubr.bf16.mxu1 %v4458_v42  ;;  %3577 = vmatprep.subr.bf16.mxu1 %v3903_v36  ;;  %v4467_v51 = vpack.c.bf16 %v4462_v50, %v4460_v48  ;;  %v2215_v58 = vpack.c.bf16 %v4460_v48, %v4451_v39  ;;  %v1910_v0 = vld [vmem:[#allocation3 + $0x60] sm:$0xff]  ;;  %v1916_v20 = vpack.c.bf16 %v4514_v19, %v1479_v10  ;;  %v2808_v49 = vld [vmem:[#allocation2 + $0x1d0] sm:$0xff]  ;;  %v3937_v48 = vld [vmem:[%s4682_s2 + $0x1b8] sm:$0xff]  }
 0x18b   : > { %3533 = vmatprep.subr.bf16.mxu0 %v3906_v40  ;;  %v1915_v7 = vpack.c.bf16 %v1910_v0, %v1477_v12  ;;  %v4508_v11 = vpack.c.bf16 %v1479_v10, %v1910_v0  ;;  %v2807_v45 = vld [vmem:[#allocation2 + $0x1c0] sm:$0xff]  ;;  %v3936_v39 = vld [vmem:[%s4682_s2 + $0x1b0] sm:$0xff]   ;;  %v3941_v12 = vld [vmem:[%s4682_s2 + $0x1d8] sm:$0xff]  }
 0x18c   : > { %3570 = vmatmul.mubr.bf16.gmra.mrb[4].mxu1 %v4467_v51  ;;  %v3930_v37 = vld [vmem:[%s4682_s2 + $0x180] sm:$0xff]   ;;  %v3944_v14 = vld [vmem:[%s4682_s2 + $0x1f0] sm:$0xff]   ;;  %v3947_v29 = vld [vmem:[%s4682_s2 + $0x208] sm:$0xff]  }
 0x18d   : > { %3578 = vmatpush3.bf16.msra.mxu1 %v3903_v36  ;;  %3589 = vmatprep.mubr.bf16.mxu1 %v1913_v54  ;;  %v2814_v36 = vpack.c.bf16 %v2807_v45, %v2806_v38  ;;  %v2811_v54 = vld [vmem:[#allocation2 + $0x200] sm:$0xff] }
 0x18e   : > { %3579 = vmatprep.subr.bf16.mxu1 %v3905_v53  ;;  %3534 = vmatpush3.bf16.msra.mxu0 %v3906_v40  ;;  %v2809_v40 = vld [vmem:[#allocation2 + $0x1e0] sm:$0xff] }
 0x18f   : > { %3535 = vmatprep.subr.bf16.mxu0 %v3908_v55  ;;  %v2815_v43 = vpack.c.bf16 %v2809_v40, %v2808_v49  ;;  %v3934_v33 = vld [vmem:[%s4682_s2 + $0x1a0] sm:$0xff]  }
 0x191   : > { %3580 = vmatpush3.bf16.msra.mxu1 %v3905_v53  ;;  %v2810_v53 = vld [vmem:[#allocation2 + $0x1f0] sm:$0xff] }
 0x192   : > { %3581 = vmatprep.subr.bf16.mxu1 %v3907_v28  ;;  %3536 = vmatpush3.bf16.msra.mxu0 %v3908_v55  ;;  %v3924_v55 = vld [vmem:[%s4682_s2 + $0x150] sm:$0xff]  }
 0x193   : > { %3537 = vmatprep.subr.bf16.mxu0 %v3910_v62 }
 0x195   : > { %3582 = vmatpush3.bf16.msra.mxu1 %v3907_v28  ;;  %v2816_v28 = vpack.c.bf16 %v2811_v54, %v2810_v53 }
 0x196   : > { %3583 = vmatprep.subr.bf16.mxu1 %v3909_v6  ;;  %3538 = vmatpush3.bf16.msra.mxu0 %v3910_v62  ;;  %v2812_v62 = vld [vmem:[#allocation2 + $0x210] sm:$0xff] }
 0x197   : > { %3539 = vmatprep.subr.bf16.mxu0 %v3912_v8 }
 0x199   : > { %3584 = vmatpush3.bf16.msra.mxu1 %v3909_v6 }
 0x19a   : > { %3585 = vmatprep.subr.bf16.mxu1 %v3911_v9  ;;  %3540 = vmatpush3.bf16.msra.mxu0 %v3912_v8  ;;  %v3940_v8 = vld [vmem:[%s4682_s2 + $0x1d0] sm:$0xff]  }
 0x19b   : > { %3717 = vmatprep.subr.bf16.mxu0 %v3951_v27 }
 0x19d   : > { %3586 = vmatpush3.bf16.msra.mxu1 %v3911_v9  ;;  %3542 = vmatmul.mubr.bf16.vlgmr.msra.gmra.mrb[8].mxu0 %v4496_v18  ;;  %v2367_v9 = vpack.c.bf16 %v3963_v47, %v4514_v19  ;;  %v3943_v47 = vld [vmem:[%s4682_s2 + $0x1e8] sm:$0xff]  }
 0x19e   : > { %3587 = vmatprep.subr.bf16.mxu1 %v3913_v13  ;;  %3545 = vmatprep.mubr.bf16.mxu0 %v4498_v57 }
 0x19f   : > { %3718 = vmatpush3.bf16.msra.mxu0 %v3951_v27 }
 0x1a1   : > { %3588 = vmatpush3.bf16.msra.mxu1 %v3913_v13  ;;  %v3942_v13 = vld [vmem:[%s4682_s2 + $0x1e0] sm:$0xff]  }
 0x1a2   : > { %3597 = vmatprep.subr.bf16.mxu1 %v3914_v60 }
 0x1a4   : > { %3590 = vmatmul.mubr.bf16.vlgmr.msra.gmra.mrb[0].mxu1 %v1914_v2  ;;  %v3949_v2 = vld [vmem:[%s4682_s2 + $0x218] sm:$0xff]  }
 0x1a5   : > { %3593 = vmatprep.mubr.bf16.mxu1 %v1915_v7  ;;  %3598 = vmatpush3.bf16.msra.mxu1 %v3914_v60  ;;  %v2513_v60 = vld [vmem:[#allocation3 + $0x91] sm:$0xff] }
 0x1a6   : > { %3599 = vmatprep.subr.bf16.mxu1 %v3915_v4  ;;  %3546 = vmatmul.mubr.bf16.gmra.mrb[12].mxu0 %v4508_v11  ;;  %v2517_v0 = vpack.c.bf16 %v2513_v60, %v4398_v23  ;;  %v3952_v23 = vld [vmem:[%s4682_s2 + $0x228] sm:$0xff]  }
 0x1a7   : > { %3719 = vmatprep.mubr.msk.bf16.mxu0 %vm397_vm0, %v2814_v36 }
 0x1a9   : > { %3600 = vmatpush3.bf16.msra.mxu1 %v3915_v4  ;;  %v2663_v4 = vld [vmem:[#allocation3 + $0x92] sm:$0xff] }
 0x1aa   : > { %3601 = vmatprep.subr.bf16.mxu1 %v3916_v15 }
 0x1ac   : > { %3594 = vmatmul.mubr.bf16.gmra.mrb[4].mxu1 %v1916_v20 }
 0x1ad   : > { %3602 = vmatpush3.bf16.msra.mxu1 %v3916_v15  ;;  %3613 = vmatprep.mubr.bf16.mxu1 %v2063_v5  ;;  %v3922_v5 = vld [vmem:[%s4682_s2 + $0x140] sm:$0xff]  }
 0x1ae   : > { %3603 = vmatprep.subr.bf16.mxu1 %v3917_v21  ;;  %3720 = vmatmul.mubr.msk.bf16.vlgmr.msra.gmra.mrb[16].mxu0 %vm397_vm0, %v2815_v43 }
 0x1af   : > { %3723 = vmatprep.mubr.msk.bf16.mxu0 %vm397_vm0, %v2816_v28 }
 0x1b1   : > { %3604 = vmatpush3.bf16.msra.mxu1 %v3917_v21 }
 0x1b2   : > { %3605 = vmatprep.subr.bf16.mxu1 %v3918_v41 }
 0x1b5   : > { %3606 = vmatpush3.bf16.msra.mxu1 %v3918_v41 }
 0x1b6   : > { %3607 = vmatprep.subr.bf16.mxu1 %v3919_v25 }
 0x1b9   : > { %3608 = vmatpush3.bf16.msra.mxu1 %v3919_v25 }
 0x1ba   : > { %3609 = vmatprep.subr.bf16.mxu1 %v3920_v59 }
 0x1bd   : > { %3610 = vmatpush3.bf16.msra.mxu1 %v3920_v59 }
 0x1be   : > { %3611 = vmatprep.subr.bf16.mxu1 %v3921_v63 }
 0x1c1   : > { %3612 = vmatpush3.bf16.msra.mxu1 %v3921_v63 }
 0x1c2   : > { %3621 = vmatprep.subr.bf16.mxu1 %v3922_v5 }
 0x1c4   : > { %3614 = vmatmul.mubr.bf16.vlgmr.msra.gmra.mrb[0].mxu1 %v2064_v1  ;;  %v2817_v1 = vpack.c.bf16 %v2813_v17, %v2812_v62 }
 0x1c5   : > { %3617 = vmatprep.mubr.bf16.mxu1 %v2065_v31  ;;  %3622 = vmatpush3.bf16.msra.mxu1 %v3922_v5  ;;  %v3932_v31 = vld [vmem:[%s4682_s2 + $0x190] sm:$0xff]  }
 0x1c6   : > { %3623 = vmatprep.subr.bf16.mxu1 %v3923_v35  ;;  %3724 = vmatmul.mubr.msk.bf16.gmra.mrb[20].mxu0 %vm397_vm0, %v2817_v1 }
 0x1c9   : > { %3624 = vmatpush3.bf16.msra.mxu1 %v3923_v35 }
 0x1ca   : > { %3625 = vmatprep.subr.bf16.mxu1 %v3924_v55 }
 0x1cc   : > { %3618 = vmatmul.mubr.bf16.gmra.mrb[4].mxu1 %v2066_v44  ;;  %v3931_v44 = vld [vmem:[%s4682_s2 + $0x188] sm:$0xff]  }
 0x1cd   : > { %3626 = vmatpush3.bf16.msra.mxu1 %v3924_v55  ;;  %3637 = vmatprep.mubr.bf16.mxu1 %v2213_v34  ;;  %v4593_v34 = vld [vmem:[#allocation3 + $0x82] sm:$0xff] }
 0x1ce   : > { %3627 = vmatprep.subr.bf16.mxu1 %v3925_v61  ;;  %v2216_v6 = vpack.c.bf16 %v4593_v34, %v4462_v50  ;;  %v3938_v50 = vld [vmem:[%s4682_s2 + $0x1c0] sm:$0xff]   ;;  %v2667_v7 = vpack.c.bf16 %v2663_v4, %v4593_v34 }
 0x1d1   : > { %3628 = vmatpush3.bf16.msra.mxu1 %v3925_v61 }
 0x1d2   : > { %3629 = vmatprep.subr.bf16.mxu1 %v3926_v22 }
 0x1d5   : > { %3630 = vmatpush3.bf16.msra.mxu1 %v3926_v22 }
 0x1d6   : > { %3631 = vmatprep.subr.bf16.mxu1 %v3927_v26 }
 0x1d9   : > { %3632 = vmatpush3.bf16.msra.mxu1 %v3927_v26 }
 0x1da   : > { %3633 = vmatprep.subr.bf16.mxu1 %v3928_v16 }
 0x1dd   : > { %3634 = vmatpush3.bf16.msra.mxu1 %v3928_v16 }
 0x1de   : > { %3635 = vmatprep.subr.bf16.mxu1 %v3929_v24 }
 0x1e1   : > { %3636 = vmatpush3.bf16.msra.mxu1 %v3929_v24 }
 0x1e2   : > { %3645 = vmatprep.subr.bf16.mxu1 %v3930_v37 }
 0x1e4   : > { %3638 = vmatmul.mubr.bf16.vlgmr.msra.gmra.mrb[0].mxu1 %v2214_v52  ;;  %v3935_v52 = vld [vmem:[%s4682_s2 + $0x1a8] sm:$0xff]  }
 0x1e5   : > { %3641 = vmatprep.mubr.bf16.mxu1 %v2215_v58  ;;  %3646 = vmatpush3.bf16.msra.mxu1 %v3930_v37  ;;  %v3939_v58 = vld [vmem:[%s4682_s2 + $0x1c8] sm:$0xff]  }
 0x1e6   : > { %3647 = vmatprep.subr.bf16.mxu1 %v3931_v44 }
 0x1e9   : > { %3648 = vmatpush3.bf16.msra.mxu1 %v3931_v44 }
 0x1ea   : > { %3649 = vmatprep.subr.bf16.mxu1 %v3932_v31 }
 0x1ec   : > { %3642 = vmatmul.mubr.bf16.gmra.mrb[4].mxu1 %v2216_v6 }
 0x1ed   : > { %3650 = vmatpush3.bf16.msra.mxu1 %v3932_v31  ;;  %3661 = vmatprep.mubr.bf16.mxu1 %v4496_v18  ;;  %v3946_v18 = vld [vmem:[%s4682_s2 + $0x200] sm:$0xff]  }
 0x1ee   : > { %3651 = vmatprep.subr.bf16.mxu1 %v3933_v30 }
 0x1f1   : > { %3652 = vmatpush3.bf16.msra.mxu1 %v3933_v30 }
 0x1f2   : > { %3653 = vmatprep.subr.bf16.mxu1 %v3934_v33 }
 0x1f5   : > { %3654 = vmatpush3.bf16.msra.mxu1 %v3934_v33 }
 0x1f6   : > { %3655 = vmatprep.subr.bf16.mxu1 %v3935_v52 }
 0x1f9   : > { %3656 = vmatpush3.bf16.msra.mxu1 %v3935_v52 }
 0x1fa   : > { %3657 = vmatprep.subr.bf16.mxu1 %v3936_v39 }
 0x1fd   : > { %3658 = vmatpush3.bf16.msra.mxu1 %v3936_v39 }
 0x1fe   : > { %3659 = vmatprep.subr.bf16.mxu1 %v3937_v48 }
 0x201   : > { %3660 = vmatpush3.bf16.msra.mxu1 %v3937_v48 }
 0x202   : > { %3669 = vmatprep.subr.bf16.mxu1 %v3938_v50 }
 0x204   : > { %3662 = vmatmul.mubr.bf16.vlgmr.msra.gmra.mrb[0].mxu1 %v4498_v57  ;;  %v3948_v57 = vld [vmem:[%s4682_s2 + $0x210] sm:$0xff]  }
 0x205   : > { %3665 = vmatprep.mubr.bf16.mxu1 %v4508_v11  ;;  %3670 = vmatpush3.bf16.msra.mxu1 %v3938_v50 }
 0x206   : > { %3671 = vmatprep.subr.bf16.mxu1 %v3939_v58 }
 0x209   : > { %3672 = vmatpush3.bf16.msra.mxu1 %v3939_v58 }
 0x20a   : > { %3673 = vmatprep.subr.bf16.mxu1 %v3940_v8 }
 0x20c   : > { %3666 = vmatmul.mubr.bf16.gmra.mrb[4].mxu1 %v2367_v9 }
 0x20d   : > { %3674 = vmatpush3.bf16.msra.mxu1 %v3940_v8  ;;  %3685 = vmatprep.mubr.bf16.mxu1 %v4385_v3  ;;  %v3945_v3 = vld [vmem:[%s4682_s2 + $0x1f8] sm:$0xff]  }
 0x20e   : > { %3675 = vmatprep.subr.bf16.mxu1 %v3941_v12 }
 0x211   : > { %3676 = vmatpush3.bf16.msra.mxu1 %v3941_v12 }
 0x212   : > { %3677 = vmatprep.subr.bf16.mxu1 %v3942_v13 }
 0x215   : > { %3678 = vmatpush3.bf16.msra.mxu1 %v3942_v13 }
 0x216   : > { %3679 = vmatprep.subr.bf16.mxu1 %v3943_v47 }
 0x219   : > { %3680 = vmatpush3.bf16.msra.mxu1 %v3943_v47 }
 0x21a   : > { %3681 = vmatprep.subr.bf16.mxu1 %v3944_v14 }
 0x21d   : > { %3682 = vmatpush3.bf16.msra.mxu1 %v3944_v14 }
 0x21e   : > { %3683 = vmatprep.subr.bf16.mxu1 %v3945_v3 }
 0x221   : > { %3684 = vmatpush3.bf16.msra.mxu1 %v3945_v3 }
 0x222   : > { %3693 = vmatprep.subr.bf16.mxu1 %v3946_v18 }
 0x224   : > { %3686 = vmatmul.mubr.bf16.vlgmr.msra.gmra.mrb[0].mxu1 %v4413_v32  ;;  %v3950_v32 = vld [vmem:[%s4682_s2 + $0x220] sm:$0xff]  }
 0x225   : > { %3689 = vmatprep.mubr.bf16.mxu1 %v4435_v46  ;;  %3694 = vmatpush3.bf16.msra.mxu1 %v3946_v18  ;;  %v3953_v46 = vld [vmem:[%s4682_s2 + $0x230] sm:$0xff]  }
 0x226   : > { %3695 = vmatprep.subr.bf16.mxu1 %v3947_v29 }
 0x229   : > { %3696 = vmatpush3.bf16.msra.mxu1 %v3947_v29 }
 0x22a   : > { %3697 = vmatprep.subr.bf16.mxu1 %v3948_v57 }
 0x22c   : > { %3690 = vmatmul.mubr.bf16.gmra.mrb[4].mxu1 %v2517_v0 }
 0x22d   : > { %3698 = vmatpush3.bf16.msra.mxu1 %v3948_v57  ;;  %3709 = vmatprep.mubr.bf16.mxu1 %v4427_v56  ;;  %v3954_v56 = vld [vmem:[%s4682_s2 + $0x238] sm:$0xff]  }
 0x22e   : > { %3699 = vmatprep.subr.bf16.mxu1 %v3949_v2 }
 0x231   : > { %3700 = vmatpush3.bf16.msra.mxu1 %v3949_v2 }
 0x232   : > { %3701 = vmatprep.subr.bf16.mxu1 %v3950_v32 }
 0x235   : > { %3702 = vmatpush3.bf16.msra.mxu1 %v3950_v32 }
 0x236   : > { %3703 = vmatprep.subr.bf16.mxu1 %v3952_v23 }
 0x239   : > { %3704 = vmatpush3.bf16.msra.mxu1 %v3952_v23 }
 0x23a   : > { %3705 = vmatprep.subr.bf16.mxu1 %v3953_v46 }
 0x23d   : > { %3706 = vmatpush3.bf16.msra.mxu1 %v3953_v46 }
 0x23e   : > { %3707 = vmatprep.subr.bf16.mxu1 %v3954_v56 }
 0x241   : > { %3708 = vmatpush3.bf16.msra.mxu1 %v3954_v56 }
 0x244   : > { %3710 = vmatmul.mubr.bf16.vlgmr.msra.gmra.mrb[0].mxu1 %v4458_v42 }
 0x245   : > { %3713 = vmatprep.mubr.bf16.mxu1 %v4467_v51 }
 0x24c   : > { %3714 = vmatmul.mubr.bf16.gmra.mrb[4].mxu1 %v2667_v7 }
 0x270   : > { %v3543_v10 = vpop.f32.mrb[8].mxu0 }
 0x271   : > { %v1724_v11 = vpop.f32.mrb[9].mxu0 }
 0x272   : > { %v3544_v15 = vpop.f32.mrb[10].mxu0 }
 0x273   : > { %v1727_v19 = vpop.f32.mrb[11].mxu0 }
 0x279   : > { %v3547_v20 = vpop.f32.mrb[12].mxu0 }
 0x27a   : > { %v1740_v21 = vpop.f32.mrb[13].mxu0 }
 0x27b   : > { %v3548_v41 = vpop.f32.mrb[14].mxu0 }
 0x27c   : > { %v1743_v25 = vpop.f32.mrb[15].mxu0 }
 0x281   : > { %v3721_v27 = vpop.f32.mrb[16].mxu0 }
 0x282   : > { %v2872_v59 = vpop.f32.mrb[17].mxu0 }
 0x283   : > { %v3722_v63 = vpop.f32.mrb[18].mxu0 }
 0x284   : > { %v2875_v5 = vpop.f32.mrb[19].mxu0 }
 0x299   : > { %v3725_v42 = vpop.f32.mrb[20].mxu0 }
 0x29a   : > { %v2888_v38 = vpop.f32.mrb[21].mxu0 }
 0x29b   : > { %v3726_v51 = vpop.f32.mrb[22].mxu0 }
 0x29c   : > { %v2891_v45 = vpop.f32.mrb[23].mxu0 }
 0x317   : > { %v3711_v49 = vpop.f32.mrb[0].mxu1 }
 0x318   : > { %v3727_v35 = vadd.f32 %v3711_v49, %v3543_v10  ;;  %v2767_v36 = vpop.f32.mrb[1].mxu1 }
 0x319   : > { %v3729_v40 = vadd.f32 %v2767_v36, %v1724_v11  ;;  %v3712_v43 = vpop.f32.mrb[2].mxu1 }
 0x31a   : > { %v3728_v53 = vadd.f32 %v3727_v35, %v3721_v27  ;;  %v3731_v54 = vadd.f32 %v3712_v43, %v3544_v15  ;;  %v2770_v55 = vpop.f32.mrb[3].mxu1 }
 0x31b   : > { %v3730_v28 = vadd.f32 %v3729_v40, %v2872_v59  ;;  %v3733_v62 = vadd.f32 %v2770_v55, %v1727_v19 }
 0x31c   : > { %2913 = vst [vmem:[%s251_s20 + $0x10] sm:$0xff] %v3728_v53  ;;  %v3732_v17 = vadd.f32 %v3731_v54, %v3722_v63 }
 0x31d   : > { %2911 = vst [vmem:[%s251_s20] sm:$0xff] %v3730_v28  ;;  %v3734_v61 = vadd.f32 %v3733_v62, %v2875_v5 }
 0x31e   : > { %2914 = vst [vmem:[%s251_s20 + $0x18] sm:$0xff] %v3732_v17 }
 0x31f   : > { %2912 = vst [vmem:[%s251_s20 + $0x8] sm:$0xff] %v3734_v61  ;;  %v3715_v1 = vpop.f32.mrb[4].mxu1 }
 0x320   : > { %v3735_v22 = vadd.f32 %v3715_v1, %v3547_v20  ;;  %v2783_v26 = vpop.f32.mrb[5].mxu1 }
 0x321   : > { %v3737_v16 = vadd.f32 %v2783_v26, %v1740_v21  ;;  %v3716_v24 = vpop.f32.mrb[6].mxu1 }
 0x322   : > { %v3736_v37 = vadd.f32 %v3735_v22, %v3725_v42  ;;  %v3739_v44 = vadd.f32 %v3716_v24, %v3548_v41  ;;  %v2786_v31 = vpop.f32.mrb[7].mxu1 }
 0x323   : > { %v3738_v34 = vadd.f32 %v3737_v16, %v2888_v38  ;;  %v3741_v6 = vadd.f32 %v2786_v31, %v1743_v25 }
 0x324   : > { %2917 = vst [vmem:[%s251_s20 + $0x30] sm:$0xff] %v3736_v37  ;;  %v3740_v30 = vadd.f32 %v3739_v44, %v3726_v51 }
 0x325   : > { %2915 = vst [vmem:[%s251_s20 + $0x20] sm:$0xff] %v3738_v34  ;;  %v3742_v33 = vadd.f32 %v3741_v6, %v2891_v45 }
 0x326   : > { %2918 = vst [vmem:[%s251_s20 + $0x38] sm:$0xff] %v3740_v30 }
 0x327   : > { %2916 = vst [vmem:[%s251_s20 + $0x28] sm:$0xff] %v3742_v33 }
 0x328 PF: > { %s16_s21 = sadd.s32 1, %s3961_s21  }
 0x329   : > { %p13_p4 = scmp.ge.s32.totalorder %s16_s21, 4  }
 0x32b   :  { %15 = sbr.rel (!%p13_p4) target bundleno = 1 (0x1), region = 97 }

</bundles_post_ra>
